<compile_context>
chip_gen: v5e
topology: v5e:2x2
jax: 0.10.0
libtpu: 0.0.40
codegen_flags: <defaults>
</compile_context>

<pallas_src>
import functools

import numpy as np
import jax
import jax.numpy as jnp
from jax import lax
from jax.experimental import pallas as pl
from jax.experimental.pallas import tpu as pltpu

LN_EPS = 1e-5                 # PyTorch nn.LayerNorm default
MXU_DTYPE = jnp.bfloat16      # matmul-input dtype; all accumulation is f32


def _layer_norm(x, gamma, beta):
    mu = jnp.mean(x, axis=-1, keepdims=True)
    var = jnp.mean(jnp.square(x - mu), axis=-1, keepdims=True)
    return (x - mu) * lax.rsqrt(var + LN_EPS) * gamma + beta


def _rsa_fused_kernel(x_ref, pre_g_ref, pre_b_ref, wq_ref, wk_ref, wv_ref,
                      wpost_ref, bpost_ref, post_g_ref, post_b_ref, out_ref,
                      *, n_blocks, heads, inv_logit_scale):
    """All n_blocks ResidualSelfAttentionCells for one batch element (one grid step)."""
    x = x_ref[0].astype(jnp.float32)                 # (N, F); resident across all blocks

    for blk in range(n_blocks):                      # small & static -> unrolled
        # pre layer norm feeds the Q/K path only (V uses the raw residual stream x),
        # exactly like the reference module.
        xn = _layer_norm(x, pre_g_ref[blk], pre_b_ref[blk])
        xn_m = xn.astype(MXU_DTYPE)
        x_m = x.astype(MXU_DTYPE)

        post = None
        for h in range(heads):                       # per-head weights: no lane slicing, no concat
            q_h = jnp.dot(xn_m, wq_ref[blk, h].astype(MXU_DTYPE),
                          preferred_element_type=jnp.float32)        # (N, ehr)
            k_h = jnp.dot(xn_m, wk_ref[blk, h].astype(MXU_DTYPE),
                          preferred_element_type=jnp.float32)        # (N, ehr)
            v_h = jnp.dot(x_m, wv_ref[blk, h].astype(MXU_DTYPE),
                          preferred_element_type=jnp.float32)        # (N, ehr)

            # contract the ehr dims of q and k directly -> no materialized transpose of k_h
            logits = lax.dot_general(
                q_h.astype(MXU_DTYPE), k_h.astype(MXU_DTYPE),
                dimension_numbers=(((1,), (1,)), ((), ())),
                preferred_element_type=jnp.float32) * inv_logit_scale   # (N, N)

            m = jnp.max(logits, axis=-1, keepdims=True)
            p = jnp.exp(logits - m)                                     # EUP
            p = p * pl.reciprocal(jnp.sum(p, axis=-1, keepdims=True), approx=True)

            att_h = jnp.dot(p.astype(MXU_DTYPE), v_h.astype(MXU_DTYPE),
                            preferred_element_type=jnp.float32)         # (N, ehr)
            # accumulate the post projection per head instead of concatenating heads
            contrib = jnp.dot(att_h.astype(MXU_DTYPE), wpost_ref[blk, h].astype(MXU_DTYPE),
                              preferred_element_type=jnp.float32)       # (N, F)
            post = contrib if post is None else post + contrib

        x = _layer_norm(x + post + bpost_ref[blk], post_g_ref[blk], post_b_ref[blk])

    # At F=32, N=8 the result is a single vreg, so a lane-dense (1, N*F) output slab would
    # trade one masked vst for an in-kernel (8,32)->(1,256) relayout of equal-or-greater cost;
    # revisit the lane-dense-output suggestion if N*F grows.
    out_ref[0] = x.astype(out_ref.dtype)


def residual_self_attention(x, params, heads, embed_dim):
    """n_blocks stacked ResidualSelfAttentionCell (max_pool_out=None -> shape-preserving)."""
    B, N, F = x.shape
    n_blocks = params["wq"].shape[0]
    ehr = embed_dim // heads
    inv_logit_scale = float(1.0 / np.sqrt(embed_dim / heads))

    kernel = functools.partial(_rsa_fused_kernel, n_blocks=n_blocks, heads=heads,
                               inv_logit_scale=inv_logit_scale)

    def invariant(shape):
        zero = (0,) * len(shape)
        return pl.BlockSpec(shape, lambda b, _z=None: zero)   # grid-invariant: DMA'd once

    return pl.pallas_call(
        kernel,
        out_shape=jax.ShapeDtypeStruct((B, N, F), x.dtype),
        grid=(B,),
        in_specs=[
            pl.BlockSpec((1, N, F), lambda b: (b, 0, 0)),      # x: one batch row per step
            invariant((n_blocks, 1, F)),                       # pre-LN gamma
            invariant((n_blocks, 1, F)),                       # pre-LN beta
            invariant((n_blocks, heads, F, ehr)),              # Wq (per block, per head)
            invariant((n_blocks, heads, F, ehr)),              # Wk
            invariant((n_blocks, heads, F, ehr)),              # Wv
            invariant((n_blocks, heads, ehr, F)),              # Wpost
            invariant((n_blocks, 1, F)),                       # bpost
            invariant((n_blocks, 1, F)),                       # post-LN gamma
            invariant((n_blocks, 1, F)),                       # post-LN beta
        ],
        out_specs=pl.BlockSpec((1, N, F), lambda b: (b, 0, 0)),
        compiler_params=pltpu.CompilerParams(dimension_semantics=("parallel",)),
    )(x, params["pre_g"], params["pre_b"], params["wq"], params["wk"], params["wv"],
      params["wpost"], params["bpost"], params["post_g"], params["post_b"])


def init_params(key, n_blocks, feature_size, heads, embed_dim,
                qk_w=0.125, v_w=0.125, post_w=0.125):
    """Deterministic synthetic init matching the module's xavier_normal_(gain) scheme.

    Weights are stored pre-transposed (x @ W) and pre-split per head:
      wq, wk, wv : (n_blocks, heads, F, ehr)     wpost : (n_blocks, heads, ehr, F)
    """
    ehr = embed_dim // heads
    qk_scale = float(np.sqrt(qk_w / feature_size))
    v_scale = float(np.sqrt(v_w / feature_size))
    post_scale = float(np.sqrt(post_w / embed_dim))

    def xavier(k, shape, gain):              # shape = (out_dim, in_dim), torch convention
        fan_out, fan_in = shape
        std = gain * np.sqrt(2.0 / (fan_in + fan_out))
        return std * jax.random.normal(k, shape, jnp.float32)

    wq_l, wk_l, wv_l, wp_l = [], [], [], []
    for bk in jax.random.split(key, n_blocks):
        ks = jax.random.split(bk, 3)
        w_qk = xavier(ks[0], (2 * embed_dim, feature_size), qk_scale)    # (2E, F)
        w_v = xavier(ks[1], (embed_dim, feature_size), v_scale)          # (E, F)
        w_post = xavier(ks[2], (feature_size, embed_dim), post_scale)    # (F, E)

        # De-interleave q/k exactly as torch's view(B,N,heads,ehr,2).unbind(-1) does.
        wqk_t = w_qk.T.reshape(feature_size, heads, ehr, 2)
        wq_l.append(jnp.transpose(wqk_t[..., 0], (1, 0, 2)))             # (heads, F, ehr)
        wk_l.append(jnp.transpose(wqk_t[..., 1], (1, 0, 2)))             # (heads, F, ehr)
        wv_l.append(jnp.transpose(w_v.T.reshape(feature_size, heads, ehr), (1, 0, 2)))
        wp_l.append(w_post.T.reshape(heads, ehr, feature_size))          # (heads, ehr, F)

    ones = jnp.ones((n_blocks, 1, feature_size), jnp.float32)
    zeros = jnp.zeros((n_blocks, 1, feature_size), jnp.float32)
    return dict(
        pre_g=ones, pre_b=zeros,
        wq=jnp.stack(wq_l), wk=jnp.stack(wk_l), wv=jnp.stack(wv_l),
        wpost=jnp.stack(wp_l),
        bpost=zeros,            # qk/v biases are zero-init -> folded away; post bias zero-init
        post_g=ones, post_b=zeros,
    )


if __name__ == "__main__":
    # Small shapes consistent with the module's (B, n_features, feature_size) input.
    B, N_FEATURES, FEATURE_SIZE = 2, 8, 32
    HEADS, EMBED_DIM, N_BLOCKS = 2, 32, 2

    key = jax.random.PRNGKey(0)
    k_in, k_par = jax.random.split(key)
    inp = jax.random.normal(k_in, (B, N_FEATURES, FEATURE_SIZE), jnp.float32)

    params = init_params(k_par, N_BLOCKS, FEATURE_SIZE, HEADS, EMBED_DIM)

    out = residual_self_attention(inp, params, HEADS, EMBED_DIM)
    out = jax.block_until_ready(out)
    assert out.shape == (B, N_FEATURES, FEATURE_SIZE)
    print("KERNEL_OK")
</pallas_src>

<mosaic_0001>
module attributes {stable_mosaic.version = 11 : i64} {
  func.func @_rsa_fused_kernel(%arg0: i32, %arg1: memref<1x8x32xf32, #tpu.memory_space<vmem>>, %arg2: memref<2x1x32xf32, #tpu.memory_space<vmem>>, %arg3: memref<2x1x32xf32, #tpu.memory_space<vmem>>, %arg4: memref<2x2x32x16xf32, #tpu.memory_space<vmem>>, %arg5: memref<2x2x32x16xf32, #tpu.memory_space<vmem>>, %arg6: memref<2x2x32x16xf32, #tpu.memory_space<vmem>>, %arg7: memref<2x2x16x32xf32, #tpu.memory_space<vmem>>, %arg8: memref<2x1x32xf32, #tpu.memory_space<vmem>>, %arg9: memref<2x1x32xf32, #tpu.memory_space<vmem>>, %arg10: memref<2x1x32xf32, #tpu.memory_space<vmem>>, %arg11: memref<1x8x32xf32, #tpu.memory_space<vmem>>) attributes {dimension_semantics = [#tpu.dimension_semantics<parallel>], iteration_bounds = array<i64: 2>, scalar_prefetch = 0 : i64, scratch_operands = 0 : i64, tpu.core_type = #tpu.core_type<tc>, window_params = [{transform_indices = @transform_0, window_bounds = array<i64: 1, 8, 32>}, {pipeline_mode = #tpu.pipeline_mode<synchronous>, transform_indices = @transform_1, window_bounds = array<i64: 2, 1, 32>}, {pipeline_mode = #tpu.pipeline_mode<synchronous>, transform_indices = @transform_2, window_bounds = array<i64: 2, 1, 32>}, {pipeline_mode = #tpu.pipeline_mode<synchronous>, transform_indices = @transform_3, window_bounds = array<i64: 2, 2, 32, 16>}, {pipeline_mode = #tpu.pipeline_mode<synchronous>, transform_indices = @transform_4, window_bounds = array<i64: 2, 2, 32, 16>}, {pipeline_mode = #tpu.pipeline_mode<synchronous>, transform_indices = @transform_5, window_bounds = array<i64: 2, 2, 32, 16>}, {pipeline_mode = #tpu.pipeline_mode<synchronous>, transform_indices = @transform_6, window_bounds = array<i64: 2, 2, 16, 32>}, {pipeline_mode = #tpu.pipeline_mode<synchronous>, transform_indices = @transform_7, window_bounds = array<i64: 2, 1, 32>}, {pipeline_mode = #tpu.pipeline_mode<synchronous>, transform_indices = @transform_8, window_bounds = array<i64: 2, 1, 32>}, {pipeline_mode = #tpu.pipeline_mode<synchronous>, transform_indices = @transform_9, window_bounds = array<i64: 2, 1, 32>}, {transform_indices = @transform_10, window_bounds = array<i64: 1, 8, 32>}]} {
    %c0 = arith.constant 0 : index
    %c0_0 = arith.constant 0 : index
    %c0_1 = arith.constant 0 : index
    %0 = vector.load %arg1[%c0, %c0_0, %c0_1] : memref<1x8x32xf32, #tpu.memory_space<vmem>>, vector<1x8x32xf32>
    %1 = vector.shape_cast %0 : vector<1x8x32xf32> to vector<8x32xf32>
    %c0_2 = arith.constant 0 : index
    %c0_3 = arith.constant 0 : index
    %c0_4 = arith.constant 0 : index
    %2 = vector.load %arg2[%c0_2, %c0_3, %c0_4] : memref<2x1x32xf32, #tpu.memory_space<vmem>>, vector<1x1x32xf32>
    %3 = vector.shape_cast %2 : vector<1x1x32xf32> to vector<1x32xf32>
    %c0_5 = arith.constant 0 : index
    %c0_6 = arith.constant 0 : index
    %c0_7 = arith.constant 0 : index
    %4 = vector.load %arg3[%c0_5, %c0_6, %c0_7] : memref<2x1x32xf32, #tpu.memory_space<vmem>>, vector<1x1x32xf32>
    %5 = vector.shape_cast %4 : vector<1x1x32xf32> to vector<1x32xf32>
    %cst = arith.constant dense<0.000000e+00> : vector<8xf32>
    %6 = vector.multi_reduction <add>, %1, %cst [1] : vector<8x32xf32> to vector<8xf32>
    %7 = vector.shape_cast %6 : vector<8xf32> to vector<8x1xf32>
    %cst_8 = arith.constant 3.200000e+01 : f32
    %8 = vector.broadcast %cst_8 : f32 to vector<8x1xf32>
    %9 = arith.divf %7, %8 : vector<8x1xf32>
    %10 = vector.broadcast %9 : vector<8x1xf32> to vector<8x32xf32>
    %11 = arith.subf %1, %10 : vector<8x32xf32>
    %12 = arith.mulf %11, %11 : vector<8x32xf32>
    %cst_9 = arith.constant dense<0.000000e+00> : vector<8xf32>
    %13 = vector.multi_reduction <add>, %12, %cst_9 [1] : vector<8x32xf32> to vector<8xf32>
    %14 = vector.shape_cast %13 : vector<8xf32> to vector<8x1xf32>
    %cst_10 = arith.constant 3.200000e+01 : f32
    %15 = vector.broadcast %cst_10 : f32 to vector<8x1xf32>
    %16 = arith.divf %14, %15 : vector<8x1xf32>
    %17 = vector.broadcast %9 : vector<8x1xf32> to vector<8x32xf32>
    %18 = arith.subf %1, %17 : vector<8x32xf32>
    %cst_11 = arith.constant 9.99999974E-6 : f32
    %19 = vector.broadcast %cst_11 : f32 to vector<8x1xf32>
    %20 = arith.addf %16, %19 : vector<8x1xf32>
    %21 = math.rsqrt %20 : vector<8x1xf32>
    %22 = vector.broadcast %21 : vector<8x1xf32> to vector<8x32xf32>
    %23 = arith.mulf %18, %22 : vector<8x32xf32>
    %24 = vector.broadcast %3 : vector<1x32xf32> to vector<8x32xf32>
    %25 = arith.mulf %23, %24 : vector<8x32xf32>
    %26 = vector.broadcast %5 : vector<1x32xf32> to vector<8x32xf32>
    %27 = arith.addf %25, %26 : vector<8x32xf32>
    %28 = arith.truncf %27 : vector<8x32xf32> to vector<8x32xbf16>
    %29 = arith.truncf %1 : vector<8x32xf32> to vector<8x32xbf16>
    %c0_12 = arith.constant 0 : index
    %c0_13 = arith.constant 0 : index
    %c0_14 = arith.constant 0 : index
    %c0_15 = arith.constant 0 : index
    %30 = vector.load %arg4[%c0_12, %c0_13, %c0_14, %c0_15] : memref<2x2x32x16xf32, #tpu.memory_space<vmem>>, vector<1x1x32x16xf32>
    %31 = vector.shape_cast %30 : vector<1x1x32x16xf32> to vector<32x16xf32>
    %32 = arith.truncf %31 : vector<32x16xf32> to vector<32x16xbf16>
    %cst_16 = arith.constant dense<0.000000e+00> : vector<8x16xf32>
    %33 = tpu.matmul %28, %32, %cst_16 {dimension_numbers = #tpu.dot_dimension_numbers<[1], [0], [0], [1], [0, 0, 1, 1], [], []>} : vector<8x32xbf16>, vector<32x16xbf16>, vector<8x16xf32> -> vector<8x16xf32>
    %c0_17 = arith.constant 0 : index
    %c0_18 = arith.constant 0 : index
    %c0_19 = arith.constant 0 : index
    %c0_20 = arith.constant 0 : index
    %34 = vector.load %arg5[%c0_17, %c0_18, %c0_19, %c0_20] : memref<2x2x32x16xf32, #tpu.memory_space<vmem>>, vector<1x1x32x16xf32>
    %35 = vector.shape_cast %34 : vector<1x1x32x16xf32> to vector<32x16xf32>
    %36 = arith.truncf %35 : vector<32x16xf32> to vector<32x16xbf16>
    %cst_21 = arith.constant dense<0.000000e+00> : vector<8x16xf32>
    %37 = tpu.matmul %28, %36, %cst_21 {dimension_numbers = #tpu.dot_dimension_numbers<[1], [0], [0], [1], [0, 0, 1, 1], [], []>} : vector<8x32xbf16>, vector<32x16xbf16>, vector<8x16xf32> -> vector<8x16xf32>
    %c0_22 = arith.constant 0 : index
    %c0_23 = arith.constant 0 : index
    %c0_24 = arith.constant 0 : index
    %c0_25 = arith.constant 0 : index
    %38 = vector.load %arg6[%c0_22, %c0_23, %c0_24, %c0_25] : memref<2x2x32x16xf32, #tpu.memory_space<vmem>>, vector<1x1x32x16xf32>
    %39 = vector.shape_cast %38 : vector<1x1x32x16xf32> to vector<32x16xf32>
    %40 = arith.truncf %39 : vector<32x16xf32> to vector<32x16xbf16>
    %cst_26 = arith.constant dense<0.000000e+00> : vector<8x16xf32>
    %41 = tpu.matmul %29, %40, %cst_26 {dimension_numbers = #tpu.dot_dimension_numbers<[1], [0], [0], [1], [0, 0, 1, 1], [], []>} : vector<8x32xbf16>, vector<32x16xbf16>, vector<8x16xf32> -> vector<8x16xf32>
    %42 = arith.truncf %33 : vector<8x16xf32> to vector<8x16xbf16>
    %43 = arith.truncf %37 : vector<8x16xf32> to vector<8x16xbf16>
    %cst_27 = arith.constant dense<0.000000e+00> : vector<8x8xf32>
    %44 = tpu.matmul %42, %43, %cst_27 {dimension_numbers = #tpu.dot_dimension_numbers<[1], [1], [0], [0], [0, 0, 1, 0], [], []>} : vector<8x16xbf16>, vector<8x16xbf16>, vector<8x8xf32> -> vector<8x8xf32>
    %cst_28 = arith.constant 2.500000e-01 : f32
    %45 = vector.broadcast %cst_28 : f32 to vector<8x8xf32>
    %46 = arith.mulf %44, %45 : vector<8x8xf32>
    %cst_29 = arith.constant dense<0xFF800000> : vector<8xf32>
    %47 = vector.multi_reduction <maximumf>, %46, %cst_29 [1] : vector<8x8xf32> to vector<8xf32>
    %48 = vector.shape_cast %47 : vector<8xf32> to vector<8x1xf32>
    %49 = vector.broadcast %48 : vector<8x1xf32> to vector<8x8xf32>
    %50 = arith.subf %46, %49 : vector<8x8xf32>
    %51 = math.exp %50 : vector<8x8xf32>
    %cst_30 = arith.constant dense<0.000000e+00> : vector<8xf32>
    %52 = vector.multi_reduction <add>, %51, %cst_30 [1] : vector<8x8xf32> to vector<8xf32>
    %53 = vector.shape_cast %52 : vector<8xf32> to vector<8x1xf32>
    %54 = tpu.reciprocal %53 {approx = true} : vector<8x1xf32> -> vector<8x1xf32>
    %55 = vector.broadcast %54 : vector<8x1xf32> to vector<8x8xf32>
    %56 = arith.mulf %51, %55 : vector<8x8xf32>
    %57 = arith.truncf %56 : vector<8x8xf32> to vector<8x8xbf16>
    %58 = arith.truncf %41 : vector<8x16xf32> to vector<8x16xbf16>
    %cst_31 = arith.constant dense<0.000000e+00> : vector<8x16xf32>
    %59 = tpu.matmul %57, %58, %cst_31 {dimension_numbers = #tpu.dot_dimension_numbers<[1], [0], [0], [1], [0, 0, 1, 1], [], []>} : vector<8x8xbf16>, vector<8x16xbf16>, vector<8x16xf32> -> vector<8x16xf32>
    %60 = arith.truncf %59 : vector<8x16xf32> to vector<8x16xbf16>
    %c0_32 = arith.constant 0 : index
    %c0_33 = arith.constant 0 : index
    %c0_34 = arith.constant 0 : index
    %c0_35 = arith.constant 0 : index
    %61 = vector.load %arg7[%c0_32, %c0_33, %c0_34, %c0_35] : memref<2x2x16x32xf32, #tpu.memory_space<vmem>>, vector<1x1x16x32xf32>
    %62 = vector.shape_cast %61 : vector<1x1x16x32xf32> to vector<16x32xf32>
    %63 = arith.truncf %62 : vector<16x32xf32> to vector<16x32xbf16>
    %cst_36 = arith.constant dense<0.000000e+00> : vector<8x32xf32>
    %64 = tpu.matmul %60, %63, %cst_36 {dimension_numbers = #tpu.dot_dimension_numbers<[1], [0], [0], [1], [0, 0, 1, 1], [], []>} : vector<8x16xbf16>, vector<16x32xbf16>, vector<8x32xf32> -> vector<8x32xf32>
    %c0_37 = arith.constant 0 : index
    %c1 = arith.constant 1 : index
    %c0_38 = arith.constant 0 : index
    %c0_39 = arith.constant 0 : index
    %65 = vector.load %arg4[%c0_37, %c1, %c0_38, %c0_39] : memref<2x2x32x16xf32, #tpu.memory_space<vmem>>, vector<1x1x32x16xf32>
    %66 = vector.shape_cast %65 : vector<1x1x32x16xf32> to vector<32x16xf32>
    %67 = arith.truncf %66 : vector<32x16xf32> to vector<32x16xbf16>
    %cst_40 = arith.constant dense<0.000000e+00> : vector<8x16xf32>
    %68 = tpu.matmul %28, %67, %cst_40 {dimension_numbers = #tpu.dot_dimension_numbers<[1], [0], [0], [1], [0, 0, 1, 1], [], []>} : vector<8x32xbf16>, vector<32x16xbf16>, vector<8x16xf32> -> vector<8x16xf32>
    %c0_41 = arith.constant 0 : index
    %c1_42 = arith.constant 1 : index
    %c0_43 = arith.constant 0 : index
    %c0_44 = arith.constant 0 : index
    %69 = vector.load %arg5[%c0_41, %c1_42, %c0_43, %c0_44] : memref<2x2x32x16xf32, #tpu.memory_space<vmem>>, vector<1x1x32x16xf32>
    %70 = vector.shape_cast %69 : vector<1x1x32x16xf32> to vector<32x16xf32>
    %71 = arith.truncf %70 : vector<32x16xf32> to vector<32x16xbf16>
    %cst_45 = arith.constant dense<0.000000e+00> : vector<8x16xf32>
    %72 = tpu.matmul %28, %71, %cst_45 {dimension_numbers = #tpu.dot_dimension_numbers<[1], [0], [0], [1], [0, 0, 1, 1], [], []>} : vector<8x32xbf16>, vector<32x16xbf16>, vector<8x16xf32> -> vector<8x16xf32>
    %c0_46 = arith.constant 0 : index
    %c1_47 = arith.constant 1 : index
    %c0_48 = arith.constant 0 : index
    %c0_49 = arith.constant 0 : index
    %73 = vector.load %arg6[%c0_46, %c1_47, %c0_48, %c0_49] : memref<2x2x32x16xf32, #tpu.memory_space<vmem>>, vector<1x1x32x16xf32>
    %74 = vector.shape_cast %73 : vector<1x1x32x16xf32> to vector<32x16xf32>
    %75 = arith.truncf %74 : vector<32x16xf32> to vector<32x16xbf16>
    %cst_50 = arith.constant dense<0.000000e+00> : vector<8x16xf32>
    %76 = tpu.matmul %29, %75, %cst_50 {dimension_numbers = #tpu.dot_dimension_numbers<[1], [0], [0], [1], [0, 0, 1, 1], [], []>} : vector<8x32xbf16>, vector<32x16xbf16>, vector<8x16xf32> -> vector<8x16xf32>
    %77 = arith.truncf %68 : vector<8x16xf32> to vector<8x16xbf16>
    %78 = arith.truncf %72 : vector<8x16xf32> to vector<8x16xbf16>
    %cst_51 = arith.constant dense<0.000000e+00> : vector<8x8xf32>
    %79 = tpu.matmul %77, %78, %cst_51 {dimension_numbers = #tpu.dot_dimension_numbers<[1], [1], [0], [0], [0, 0, 1, 0], [], []>} : vector<8x16xbf16>, vector<8x16xbf16>, vector<8x8xf32> -> vector<8x8xf32>
    %cst_52 = arith.constant 2.500000e-01 : f32
    %80 = vector.broadcast %cst_52 : f32 to vector<8x8xf32>
    %81 = arith.mulf %79, %80 : vector<8x8xf32>
    %cst_53 = arith.constant dense<0xFF800000> : vector<8xf32>
    %82 = vector.multi_reduction <maximumf>, %81, %cst_53 [1] : vector<8x8xf32> to vector<8xf32>
    %83 = vector.shape_cast %82 : vector<8xf32> to vector<8x1xf32>
    %84 = vector.broadcast %83 : vector<8x1xf32> to vector<8x8xf32>
    %85 = arith.subf %81, %84 : vector<8x8xf32>
    %86 = math.exp %85 : vector<8x8xf32>
    %cst_54 = arith.constant dense<0.000000e+00> : vector<8xf32>
    %87 = vector.multi_reduction <add>, %86, %cst_54 [1] : vector<8x8xf32> to vector<8xf32>
    %88 = vector.shape_cast %87 : vector<8xf32> to vector<8x1xf32>
    %89 = tpu.reciprocal %88 {approx = true} : vector<8x1xf32> -> vector<8x1xf32>
    %90 = vector.broadcast %89 : vector<8x1xf32> to vector<8x8xf32>
    %91 = arith.mulf %86, %90 : vector<8x8xf32>
    %92 = arith.truncf %91 : vector<8x8xf32> to vector<8x8xbf16>
    %93 = arith.truncf %76 : vector<8x16xf32> to vector<8x16xbf16>
    %cst_55 = arith.constant dense<0.000000e+00> : vector<8x16xf32>
    %94 = tpu.matmul %92, %93, %cst_55 {dimension_numbers = #tpu.dot_dimension_numbers<[1], [0], [0], [1], [0, 0, 1, 1], [], []>} : vector<8x8xbf16>, vector<8x16xbf16>, vector<8x16xf32> -> vector<8x16xf32>
    %95 = arith.truncf %94 : vector<8x16xf32> to vector<8x16xbf16>
    %c0_56 = arith.constant 0 : index
    %c1_57 = arith.constant 1 : index
    %c0_58 = arith.constant 0 : index
    %c0_59 = arith.constant 0 : index
    %96 = vector.load %arg7[%c0_56, %c1_57, %c0_58, %c0_59] : memref<2x2x16x32xf32, #tpu.memory_space<vmem>>, vector<1x1x16x32xf32>
    %97 = vector.shape_cast %96 : vector<1x1x16x32xf32> to vector<16x32xf32>
    %98 = arith.truncf %97 : vector<16x32xf32> to vector<16x32xbf16>
    %cst_60 = arith.constant dense<0.000000e+00> : vector<8x32xf32>
    %99 = tpu.matmul %95, %98, %cst_60 {dimension_numbers = #tpu.dot_dimension_numbers<[1], [0], [0], [1], [0, 0, 1, 1], [], []>} : vector<8x16xbf16>, vector<16x32xbf16>, vector<8x32xf32> -> vector<8x32xf32>
    %100 = arith.addf %64, %99 : vector<8x32xf32>
    %101 = arith.addf %1, %100 : vector<8x32xf32>
    %c0_61 = arith.constant 0 : index
    %c0_62 = arith.constant 0 : index
    %c0_63 = arith.constant 0 : index
    %102 = vector.load %arg8[%c0_61, %c0_62, %c0_63] : memref<2x1x32xf32, #tpu.memory_space<vmem>>, vector<1x1x32xf32>
    %103 = vector.shape_cast %102 : vector<1x1x32xf32> to vector<1x32xf32>
    %104 = vector.broadcast %103 : vector<1x32xf32> to vector<8x32xf32>
    %105 = arith.addf %101, %104 : vector<8x32xf32>
    %c0_64 = arith.constant 0 : index
    %c0_65 = arith.constant 0 : index
    %c0_66 = arith.constant 0 : index
    %106 = vector.load %arg9[%c0_64, %c0_65, %c0_66] : memref<2x1x32xf32, #tpu.memory_space<vmem>>, vector<1x1x32xf32>
    %107 = vector.shape_cast %106 : vector<1x1x32xf32> to vector<1x32xf32>
    %c0_67 = arith.constant 0 : index
    %c0_68 = arith.constant 0 : index
    %c0_69 = arith.constant 0 : index
    %108 = vector.load %arg10[%c0_67, %c0_68, %c0_69] : memref<2x1x32xf32, #tpu.memory_space<vmem>>, vector<1x1x32xf32>
    %109 = vector.shape_cast %108 : vector<1x1x32xf32> to vector<1x32xf32>
    %cst_70 = arith.constant dense<0.000000e+00> : vector<8xf32>
    %110 = vector.multi_reduction <add>, %105, %cst_70 [1] : vector<8x32xf32> to vector<8xf32>
    %111 = vector.shape_cast %110 : vector<8xf32> to vector<8x1xf32>
    %cst_71 = arith.constant 3.200000e+01 : f32
    %112 = vector.broadcast %cst_71 : f32 to vector<8x1xf32>
    %113 = arith.divf %111, %112 : vector<8x1xf32>
    %114 = vector.broadcast %113 : vector<8x1xf32> to vector<8x32xf32>
    %115 = arith.subf %105, %114 : vector<8x32xf32>
    %116 = arith.mulf %115, %115 : vector<8x32xf32>
    %cst_72 = arith.constant dense<0.000000e+00> : vector<8xf32>
    %117 = vector.multi_reduction <add>, %116, %cst_72 [1] : vector<8x32xf32> to vector<8xf32>
    %118 = vector.shape_cast %117 : vector<8xf32> to vector<8x1xf32>
    %cst_73 = arith.constant 3.200000e+01 : f32
    %119 = vector.broadcast %cst_73 : f32 to vector<8x1xf32>
    %120 = arith.divf %118, %119 : vector<8x1xf32>
    %121 = vector.broadcast %113 : vector<8x1xf32> to vector<8x32xf32>
    %122 = arith.subf %105, %121 : vector<8x32xf32>
    %cst_74 = arith.constant 9.99999974E-6 : f32
    %123 = vector.broadcast %cst_74 : f32 to vector<8x1xf32>
    %124 = arith.addf %120, %123 : vector<8x1xf32>
    %125 = math.rsqrt %124 : vector<8x1xf32>
    %126 = vector.broadcast %125 : vector<8x1xf32> to vector<8x32xf32>
    %127 = arith.mulf %122, %126 : vector<8x32xf32>
    %128 = vector.broadcast %107 : vector<1x32xf32> to vector<8x32xf32>
    %129 = arith.mulf %127, %128 : vector<8x32xf32>
    %130 = vector.broadcast %109 : vector<1x32xf32> to vector<8x32xf32>
    %131 = arith.addf %129, %130 : vector<8x32xf32>
    %c1_75 = arith.constant 1 : index
    %c0_76 = arith.constant 0 : index
    %c0_77 = arith.constant 0 : index
    %132 = vector.load %arg2[%c1_75, %c0_76, %c0_77] : memref<2x1x32xf32, #tpu.memory_space<vmem>>, vector<1x1x32xf32>
    %133 = vector.shape_cast %132 : vector<1x1x32xf32> to vector<1x32xf32>
    %c1_78 = arith.constant 1 : index
    %c0_79 = arith.constant 0 : index
    %c0_80 = arith.constant 0 : index
    %134 = vector.load %arg3[%c1_78, %c0_79, %c0_80] : memref<2x1x32xf32, #tpu.memory_space<vmem>>, vector<1x1x32xf32>
    %135 = vector.shape_cast %134 : vector<1x1x32xf32> to vector<1x32xf32>
    %cst_81 = arith.constant dense<0.000000e+00> : vector<8xf32>
    %136 = vector.multi_reduction <add>, %131, %cst_81 [1] : vector<8x32xf32> to vector<8xf32>
    %137 = vector.shape_cast %136 : vector<8xf32> to vector<8x1xf32>
    %cst_82 = arith.constant 3.200000e+01 : f32
    %138 = vector.broadcast %cst_82 : f32 to vector<8x1xf32>
    %139 = arith.divf %137, %138 : vector<8x1xf32>
    %140 = vector.broadcast %139 : vector<8x1xf32> to vector<8x32xf32>
    %141 = arith.subf %131, %140 : vector<8x32xf32>
    %142 = arith.mulf %141, %141 : vector<8x32xf32>
    %cst_83 = arith.constant dense<0.000000e+00> : vector<8xf32>
    %143 = vector.multi_reduction <add>, %142, %cst_83 [1] : vector<8x32xf32> to vector<8xf32>
    %144 = vector.shape_cast %143 : vector<8xf32> to vector<8x1xf32>
    %cst_84 = arith.constant 3.200000e+01 : f32
    %145 = vector.broadcast %cst_84 : f32 to vector<8x1xf32>
    %146 = arith.divf %144, %145 : vector<8x1xf32>
    %147 = vector.broadcast %139 : vector<8x1xf32> to vector<8x32xf32>
    %148 = arith.subf %131, %147 : vector<8x32xf32>
    %cst_85 = arith.constant 9.99999974E-6 : f32
    %149 = vector.broadcast %cst_85 : f32 to vector<8x1xf32>
    %150 = arith.addf %146, %149 : vector<8x1xf32>
    %151 = math.rsqrt %150 : vector<8x1xf32>
    %152 = vector.broadcast %151 : vector<8x1xf32> to vector<8x32xf32>
    %153 = arith.mulf %148, %152 : vector<8x32xf32>
    %154 = vector.broadcast %133 : vector<1x32xf32> to vector<8x32xf32>
    %155 = arith.mulf %153, %154 : vector<8x32xf32>
    %156 = vector.broadcast %135 : vector<1x32xf32> to vector<8x32xf32>
    %157 = arith.addf %155, %156 : vector<8x32xf32>
    %158 = arith.truncf %157 : vector<8x32xf32> to vector<8x32xbf16>
    %159 = arith.truncf %131 : vector<8x32xf32> to vector<8x32xbf16>
    %c1_86 = arith.constant 1 : index
    %c0_87 = arith.constant 0 : index
    %c0_88 = arith.constant 0 : index
    %c0_89 = arith.constant 0 : index
    %160 = vector.load %arg4[%c1_86, %c0_87, %c0_88, %c0_89] : memref<2x2x32x16xf32, #tpu.memory_space<vmem>>, vector<1x1x32x16xf32>
    %161 = vector.shape_cast %160 : vector<1x1x32x16xf32> to vector<32x16xf32>
    %162 = arith.truncf %161 : vector<32x16xf32> to vector<32x16xbf16>
    %cst_90 = arith.constant dense<0.000000e+00> : vector<8x16xf32>
    %163 = tpu.matmul %158, %162, %cst_90 {dimension_numbers = #tpu.dot_dimension_numbers<[1], [0], [0], [1], [0, 0, 1, 1], [], []>} : vector<8x32xbf16>, vector<32x16xbf16>, vector<8x16xf32> -> vector<8x16xf32>
    %c1_91 = arith.constant 1 : index
    %c0_92 = arith.constant 0 : index
    %c0_93 = arith.constant 0 : index
    %c0_94 = arith.constant 0 : index
    %164 = vector.load %arg5[%c1_91, %c0_92, %c0_93, %c0_94] : memref<2x2x32x16xf32, #tpu.memory_space<vmem>>, vector<1x1x32x16xf32>
    %165 = vector.shape_cast %164 : vector<1x1x32x16xf32> to vector<32x16xf32>
    %166 = arith.truncf %165 : vector<32x16xf32> to vector<32x16xbf16>
    %cst_95 = arith.constant dense<0.000000e+00> : vector<8x16xf32>
    %167 = tpu.matmul %158, %166, %cst_95 {dimension_numbers = #tpu.dot_dimension_numbers<[1], [0], [0], [1], [0, 0, 1, 1], [], []>} : vector<8x32xbf16>, vector<32x16xbf16>, vector<8x16xf32> -> vector<8x16xf32>
    %c1_96 = arith.constant 1 : index
    %c0_97 = arith.constant 0 : index
    %c0_98 = arith.constant 0 : index
    %c0_99 = arith.constant 0 : index
    %168 = vector.load %arg6[%c1_96, %c0_97, %c0_98, %c0_99] : memref<2x2x32x16xf32, #tpu.memory_space<vmem>>, vector<1x1x32x16xf32>
    %169 = vector.shape_cast %168 : vector<1x1x32x16xf32> to vector<32x16xf32>
    %170 = arith.truncf %169 : vector<32x16xf32> to vector<32x16xbf16>
    %cst_100 = arith.constant dense<0.000000e+00> : vector<8x16xf32>
    %171 = tpu.matmul %159, %170, %cst_100 {dimension_numbers = #tpu.dot_dimension_numbers<[1], [0], [0], [1], [0, 0, 1, 1], [], []>} : vector<8x32xbf16>, vector<32x16xbf16>, vector<8x16xf32> -> vector<8x16xf32>
    %172 = arith.truncf %163 : vector<8x16xf32> to vector<8x16xbf16>
    %173 = arith.truncf %167 : vector<8x16xf32> to vector<8x16xbf16>
    %cst_101 = arith.constant dense<0.000000e+00> : vector<8x8xf32>
    %174 = tpu.matmul %172, %173, %cst_101 {dimension_numbers = #tpu.dot_dimension_numbers<[1], [1], [0], [0], [0, 0, 1, 0], [], []>} : vector<8x16xbf16>, vector<8x16xbf16>, vector<8x8xf32> -> vector<8x8xf32>
    %cst_102 = arith.constant 2.500000e-01 : f32
    %175 = vector.broadcast %cst_102 : f32 to vector<8x8xf32>
    %176 = arith.mulf %174, %175 : vector<8x8xf32>
    %cst_103 = arith.constant dense<0xFF800000> : vector<8xf32>
    %177 = vector.multi_reduction <maximumf>, %176, %cst_103 [1] : vector<8x8xf32> to vector<8xf32>
    %178 = vector.shape_cast %177 : vector<8xf32> to vector<8x1xf32>
    %179 = vector.broadcast %178 : vector<8x1xf32> to vector<8x8xf32>
    %180 = arith.subf %176, %179 : vector<8x8xf32>
    %181 = math.exp %180 : vector<8x8xf32>
    %cst_104 = arith.constant dense<0.000000e+00> : vector<8xf32>
    %182 = vector.multi_reduction <add>, %181, %cst_104 [1] : vector<8x8xf32> to vector<8xf32>
    %183 = vector.shape_cast %182 : vector<8xf32> to vector<8x1xf32>
    %184 = tpu.reciprocal %183 {approx = true} : vector<8x1xf32> -> vector<8x1xf32>
    %185 = vector.broadcast %184 : vector<8x1xf32> to vector<8x8xf32>
    %186 = arith.mulf %181, %185 : vector<8x8xf32>
    %187 = arith.truncf %186 : vector<8x8xf32> to vector<8x8xbf16>
    %188 = arith.truncf %171 : vector<8x16xf32> to vector<8x16xbf16>
    %cst_105 = arith.constant dense<0.000000e+00> : vector<8x16xf32>
    %189 = tpu.matmul %187, %188, %cst_105 {dimension_numbers = #tpu.dot_dimension_numbers<[1], [0], [0], [1], [0, 0, 1, 1], [], []>} : vector<8x8xbf16>, vector<8x16xbf16>, vector<8x16xf32> -> vector<8x16xf32>
    %190 = arith.truncf %189 : vector<8x16xf32> to vector<8x16xbf16>
    %c1_106 = arith.constant 1 : index
    %c0_107 = arith.constant 0 : index
    %c0_108 = arith.constant 0 : index
    %c0_109 = arith.constant 0 : index
    %191 = vector.load %arg7[%c1_106, %c0_107, %c0_108, %c0_109] : memref<2x2x16x32xf32, #tpu.memory_space<vmem>>, vector<1x1x16x32xf32>
    %192 = vector.shape_cast %191 : vector<1x1x16x32xf32> to vector<16x32xf32>
    %193 = arith.truncf %192 : vector<16x32xf32> to vector<16x32xbf16>
    %cst_110 = arith.constant dense<0.000000e+00> : vector<8x32xf32>
    %194 = tpu.matmul %190, %193, %cst_110 {dimension_numbers = #tpu.dot_dimension_numbers<[1], [0], [0], [1], [0, 0, 1, 1], [], []>} : vector<8x16xbf16>, vector<16x32xbf16>, vector<8x32xf32> -> vector<8x32xf32>
    %c1_111 = arith.constant 1 : index
    %c1_112 = arith.constant 1 : index
    %c0_113 = arith.constant 0 : index
    %c0_114 = arith.constant 0 : index
    %195 = vector.load %arg4[%c1_111, %c1_112, %c0_113, %c0_114] : memref<2x2x32x16xf32, #tpu.memory_space<vmem>>, vector<1x1x32x16xf32>
    %196 = vector.shape_cast %195 : vector<1x1x32x16xf32> to vector<32x16xf32>
    %197 = arith.truncf %196 : vector<32x16xf32> to vector<32x16xbf16>
    %cst_115 = arith.constant dense<0.000000e+00> : vector<8x16xf32>
    %198 = tpu.matmul %158, %197, %cst_115 {dimension_numbers = #tpu.dot_dimension_numbers<[1], [0], [0], [1], [0, 0, 1, 1], [], []>} : vector<8x32xbf16>, vector<32x16xbf16>, vector<8x16xf32> -> vector<8x16xf32>
    %c1_116 = arith.constant 1 : index
    %c1_117 = arith.constant 1 : index
    %c0_118 = arith.constant 0 : index
    %c0_119 = arith.constant 0 : index
    %199 = vector.load %arg5[%c1_116, %c1_117, %c0_118, %c0_119] : memref<2x2x32x16xf32, #tpu.memory_space<vmem>>, vector<1x1x32x16xf32>
    %200 = vector.shape_cast %199 : vector<1x1x32x16xf32> to vector<32x16xf32>
    %201 = arith.truncf %200 : vector<32x16xf32> to vector<32x16xbf16>
    %cst_120 = arith.constant dense<0.000000e+00> : vector<8x16xf32>
    %202 = tpu.matmul %158, %201, %cst_120 {dimension_numbers = #tpu.dot_dimension_numbers<[1], [0], [0], [1], [0, 0, 1, 1], [], []>} : vector<8x32xbf16>, vector<32x16xbf16>, vector<8x16xf32> -> vector<8x16xf32>
    %c1_121 = arith.constant 1 : index
    %c1_122 = arith.constant 1 : index
    %c0_123 = arith.constant 0 : index
    %c0_124 = arith.constant 0 : index
    %203 = vector.load %arg6[%c1_121, %c1_122, %c0_123, %c0_124] : memref<2x2x32x16xf32, #tpu.memory_space<vmem>>, vector<1x1x32x16xf32>
    %204 = vector.shape_cast %203 : vector<1x1x32x16xf32> to vector<32x16xf32>
    %205 = arith.truncf %204 : vector<32x16xf32> to vector<32x16xbf16>
    %cst_125 = arith.constant dense<0.000000e+00> : vector<8x16xf32>
    %206 = tpu.matmul %159, %205, %cst_125 {dimension_numbers = #tpu.dot_dimension_numbers<[1], [0], [0], [1], [0, 0, 1, 1], [], []>} : vector<8x32xbf16>, vector<32x16xbf16>, vector<8x16xf32> -> vector<8x16xf32>
    %207 = arith.truncf %198 : vector<8x16xf32> to vector<8x16xbf16>
    %208 = arith.truncf %202 : vector<8x16xf32> to vector<8x16xbf16>
    %cst_126 = arith.constant dense<0.000000e+00> : vector<8x8xf32>
    %209 = tpu.matmul %207, %208, %cst_126 {dimension_numbers = #tpu.dot_dimension_numbers<[1], [1], [0], [0], [0, 0, 1, 0], [], []>} : vector<8x16xbf16>, vector<8x16xbf16>, vector<8x8xf32> -> vector<8x8xf32>
    %cst_127 = arith.constant 2.500000e-01 : f32
    %210 = vector.broadcast %cst_127 : f32 to vector<8x8xf32>
    %211 = arith.mulf %209, %210 : vector<8x8xf32>
    %cst_128 = arith.constant dense<0xFF800000> : vector<8xf32>
    %212 = vector.multi_reduction <maximumf>, %211, %cst_128 [1] : vector<8x8xf32> to vector<8xf32>
    %213 = vector.shape_cast %212 : vector<8xf32> to vector<8x1xf32>
    %214 = vector.broadcast %213 : vector<8x1xf32> to vector<8x8xf32>
    %215 = arith.subf %211, %214 : vector<8x8xf32>
    %216 = math.exp %215 : vector<8x8xf32>
    %cst_129 = arith.constant dense<0.000000e+00> : vector<8xf32>
    %217 = vector.multi_reduction <add>, %216, %cst_129 [1] : vector<8x8xf32> to vector<8xf32>
    %218 = vector.shape_cast %217 : vector<8xf32> to vector<8x1xf32>
    %219 = tpu.reciprocal %218 {approx = true} : vector<8x1xf32> -> vector<8x1xf32>
    %220 = vector.broadcast %219 : vector<8x1xf32> to vector<8x8xf32>
    %221 = arith.mulf %216, %220 : vector<8x8xf32>
    %222 = arith.truncf %221 : vector<8x8xf32> to vector<8x8xbf16>
    %223 = arith.truncf %206 : vector<8x16xf32> to vector<8x16xbf16>
    %cst_130 = arith.constant dense<0.000000e+00> : vector<8x16xf32>
    %224 = tpu.matmul %222, %223, %cst_130 {dimension_numbers = #tpu.dot_dimension_numbers<[1], [0], [0], [1], [0, 0, 1, 1], [], []>} : vector<8x8xbf16>, vector<8x16xbf16>, vector<8x16xf32> -> vector<8x16xf32>
    %225 = arith.truncf %224 : vector<8x16xf32> to vector<8x16xbf16>
    %c1_131 = arith.constant 1 : index
    %c1_132 = arith.constant 1 : index
    %c0_133 = arith.constant 0 : index
    %c0_134 = arith.constant 0 : index
    %226 = vector.load %arg7[%c1_131, %c1_132, %c0_133, %c0_134] : memref<2x2x16x32xf32, #tpu.memory_space<vmem>>, vector<1x1x16x32xf32>
    %227 = vector.shape_cast %226 : vector<1x1x16x32xf32> to vector<16x32xf32>
    %228 = arith.truncf %227 : vector<16x32xf32> to vector<16x32xbf16>
    %cst_135 = arith.constant dense<0.000000e+00> : vector<8x32xf32>
    %229 = tpu.matmul %225, %228, %cst_135 {dimension_numbers = #tpu.dot_dimension_numbers<[1], [0], [0], [1], [0, 0, 1, 1], [], []>} : vector<8x16xbf16>, vector<16x32xbf16>, vector<8x32xf32> -> vector<8x32xf32>
    %230 = arith.addf %194, %229 : vector<8x32xf32>
    %231 = arith.addf %131, %230 : vector<8x32xf32>
    %c1_136 = arith.constant 1 : index
    %c0_137 = arith.constant 0 : index
    %c0_138 = arith.constant 0 : index
    %232 = vector.load %arg8[%c1_136, %c0_137, %c0_138] : memref<2x1x32xf32, #tpu.memory_space<vmem>>, vector<1x1x32xf32>
    %233 = vector.shape_cast %232 : vector<1x1x32xf32> to vector<1x32xf32>
    %234 = vector.broadcast %233 : vector<1x32xf32> to vector<8x32xf32>
    %235 = arith.addf %231, %234 : vector<8x32xf32>
    %c1_139 = arith.constant 1 : index
    %c0_140 = arith.constant 0 : index
    %c0_141 = arith.constant 0 : index
    %236 = vector.load %arg9[%c1_139, %c0_140, %c0_141] : memref<2x1x32xf32, #tpu.memory_space<vmem>>, vector<1x1x32xf32>
    %237 = vector.shape_cast %236 : vector<1x1x32xf32> to vector<1x32xf32>
    %c1_142 = arith.constant 1 : index
    %c0_143 = arith.constant 0 : index
    %c0_144 = arith.constant 0 : index
    %238 = vector.load %arg10[%c1_142, %c0_143, %c0_144] : memref<2x1x32xf32, #tpu.memory_space<vmem>>, vector<1x1x32xf32>
    %239 = vector.shape_cast %238 : vector<1x1x32xf32> to vector<1x32xf32>
    %cst_145 = arith.constant dense<0.000000e+00> : vector<8xf32>
    %240 = vector.multi_reduction <add>, %235, %cst_145 [1] : vector<8x32xf32> to vector<8xf32>
    %241 = vector.shape_cast %240 : vector<8xf32> to vector<8x1xf32>
    %cst_146 = arith.constant 3.200000e+01 : f32
    %242 = vector.broadcast %cst_146 : f32 to vector<8x1xf32>
    %243 = arith.divf %241, %242 : vector<8x1xf32>
    %244 = vector.broadcast %243 : vector<8x1xf32> to vector<8x32xf32>
    %245 = arith.subf %235, %244 : vector<8x32xf32>
    %246 = arith.mulf %245, %245 : vector<8x32xf32>
    %cst_147 = arith.constant dense<0.000000e+00> : vector<8xf32>
    %247 = vector.multi_reduction <add>, %246, %cst_147 [1] : vector<8x32xf32> to vector<8xf32>
    %248 = vector.shape_cast %247 : vector<8xf32> to vector<8x1xf32>
    %cst_148 = arith.constant 3.200000e+01 : f32
    %249 = vector.broadcast %cst_148 : f32 to vector<8x1xf32>
    %250 = arith.divf %248, %249 : vector<8x1xf32>
    %251 = vector.broadcast %243 : vector<8x1xf32> to vector<8x32xf32>
    %252 = arith.subf %235, %251 : vector<8x32xf32>
    %cst_149 = arith.constant 9.99999974E-6 : f32
    %253 = vector.broadcast %cst_149 : f32 to vector<8x1xf32>
    %254 = arith.addf %250, %253 : vector<8x1xf32>
    %255 = math.rsqrt %254 : vector<8x1xf32>
    %256 = vector.broadcast %255 : vector<8x1xf32> to vector<8x32xf32>
    %257 = arith.mulf %252, %256 : vector<8x32xf32>
    %258 = vector.broadcast %237 : vector<1x32xf32> to vector<8x32xf32>
    %259 = arith.mulf %257, %258 : vector<8x32xf32>
    %260 = vector.broadcast %239 : vector<1x32xf32> to vector<8x32xf32>
    %261 = arith.addf %259, %260 : vector<8x32xf32>
    %c0_150 = arith.constant 0 : index
    %c0_151 = arith.constant 0 : index
    %c0_152 = arith.constant 0 : index
    %262 = vector.load %arg11[%c0_150, %c0_151, %c0_152] : memref<1x8x32xf32, #tpu.memory_space<vmem>>, vector<1x8x32xf32>
    %263 = vector.shape_cast %262 : vector<1x8x32xf32> to vector<8x32xf32>
    %264 = vector.shape_cast %261 : vector<8x32xf32> to vector<1x8x32xf32>
    tpu.vector_store %arg11[%c0_150, %c0_151, %c0_152], %264 {strides = array<i32>} : memref<1x8x32xf32, #tpu.memory_space<vmem>>, vector<1x8x32xf32>,
    return
  }
  func.func @transform_0(%arg0: i32) -> (i32, i32, i32) {
    %c0_i32 = arith.constant 0 : i32
    %c0_i32_0 = arith.constant 0 : i32
    %c0_i32_1 = arith.constant 0 : i32
    return %arg0, %c0_i32, %c0_i32_0 : i32, i32, i32
  }
  func.func @transform_1(%arg0: i32) -> (i32, i32, i32) {
    %c0_i32 = arith.constant 0 : i32
    %c0_i32_0 = arith.constant 0 : i32
    %c0_i32_1 = arith.constant 0 : i32
    %c0_i32_2 = arith.constant 0 : i32
    return %c0_i32, %c0_i32_0, %c0_i32_1 : i32, i32, i32
  }
  func.func @transform_2(%arg0: i32) -> (i32, i32, i32) {
    %c0_i32 = arith.constant 0 : i32
    %c0_i32_0 = arith.constant 0 : i32
    %c0_i32_1 = arith.constant 0 : i32
    %c0_i32_2 = arith.constant 0 : i32
    return %c0_i32, %c0_i32_0, %c0_i32_1 : i32, i32, i32
  }
  func.func @transform_3(%arg0: i32) -> (i32, i32, i32, i32) {
    %c0_i32 = arith.constant 0 : i32
    %c0_i32_0 = arith.constant 0 : i32
    %c0_i32_1 = arith.constant 0 : i32
    %c0_i32_2 = arith.constant 0 : i32
    %c0_i32_3 = arith.constant 0 : i32
    return %c0_i32, %c0_i32_0, %c0_i32_1, %c0_i32_2 : i32, i32, i32, i32
  }
  func.func @transform_4(%arg0: i32) -> (i32, i32, i32, i32) {
    %c0_i32 = arith.constant 0 : i32
    %c0_i32_0 = arith.constant 0 : i32
    %c0_i32_1 = arith.constant 0 : i32
    %c0_i32_2 = arith.constant 0 : i32
    %c0_i32_3 = arith.constant 0 : i32
    return %c0_i32, %c0_i32_0, %c0_i32_1, %c0_i32_2 : i32, i32, i32, i32
  }
  func.func @transform_5(%arg0: i32) -> (i32, i32, i32, i32) {
    %c0_i32 = arith.constant 0 : i32
    %c0_i32_0 = arith.constant 0 : i32
    %c0_i32_1 = arith.constant 0 : i32
    %c0_i32_2 = arith.constant 0 : i32
    %c0_i32_3 = arith.constant 0 : i32
    return %c0_i32, %c0_i32_0, %c0_i32_1, %c0_i32_2 : i32, i32, i32, i32
  }
  func.func @transform_6(%arg0: i32) -> (i32, i32, i32, i32) {
    %c0_i32 = arith.constant 0 : i32
    %c0_i32_0 = arith.constant 0 : i32
    %c0_i32_1 = arith.constant 0 : i32
    %c0_i32_2 = arith.constant 0 : i32
    %c0_i32_3 = arith.constant 0 : i32
    return %c0_i32, %c0_i32_0, %c0_i32_1, %c0_i32_2 : i32, i32, i32, i32
  }
  func.func @transform_7(%arg0: i32) -> (i32, i32, i32) {
    %c0_i32 = arith.constant 0 : i32
    %c0_i32_0 = arith.constant 0 : i32
    %c0_i32_1 = arith.constant 0 : i32
    %c0_i32_2 = arith.constant 0 : i32
    return %c0_i32, %c0_i32_0, %c0_i32_1 : i32, i32, i32
  }
  func.func @transform_8(%arg0: i32) -> (i32, i32, i32) {
    %c0_i32 = arith.constant 0 : i32
    %c0_i32_0 = arith.constant 0 : i32
    %c0_i32_1 = arith.constant 0 : i32
    %c0_i32_2 = arith.constant 0 : i32
    return %c0_i32, %c0_i32_0, %c0_i32_1 : i32, i32, i32
  }
  func.func @transform_9(%arg0: i32) -> (i32, i32, i32) {
    %c0_i32 = arith.constant 0 : i32
    %c0_i32_0 = arith.constant 0 : i32
    %c0_i32_1 = arith.constant 0 : i32
    %c0_i32_2 = arith.constant 0 : i32
    return %c0_i32, %c0_i32_0, %c0_i32_1 : i32, i32, i32
  }
  func.func @transform_10(%arg0: i32) -> (i32, i32, i32) {
    %c0_i32 = arith.constant 0 : i32
    %c0_i32_0 = arith.constant 0 : i32
    %c0_i32_1 = arith.constant 0 : i32
    return %arg0, %c0_i32, %c0_i32_0 : i32, i32, i32
  }
}

</mosaic_0001>

<bundles_post_ra>
// kernel: tpu_custom_call.1
= control target key start
LH: loop header
LB: loop body
LE: loop exit
PB: predicated region body
PF: predicated region fallthrough
CT: control target
= control target key end

     0   :  { %s1782_s0 = inlined_call_operand.vmem [shape: f32[2,8,32], index: 0, kind: input, shape index: {}]   ;;  %s1783_s1 = inlined_call_operand.vmem [shape: f32[2,1,32], index: 1, kind: input, shape index: {}]   ;;  %s1784_s2 = inlined_call_operand.vmem [shape: f32[2,1,32], index: 2, kind: input, shape index: {}]   ;;  %s1785_s3 = inlined_call_operand.vmem [shape: f32[2,2,32,16], index: 3, kind: input, shape index: {}]   ;;  %s1786_s4 = inlined_call_operand.vmem [shape: f32[2,2,32,16], index: 4, kind: input, shape index: {}]   ;;  %s1787_s5 = inlined_call_operand.vmem [shape: f32[2,2,32,16], index: 5, kind: input, shape index: {}]   ;;  %s1788_s6 = inlined_call_operand.vmem [shape: f32[2,2,16,32], index: 6, kind: input, shape index: {}]   ;;  %s1789_s7 = inlined_call_operand.vmem [shape: f32[2,1,32], index: 7, kind: input, shape index: {}]   ;;  %s1790_s8 = inlined_call_operand.vmem [shape: f32[2,1,32], index: 8, kind: input, shape index: {}]   ;;  %s1791_s9 = inlined_call_operand.vmem [shape: f32[2,1,32], index: 9, kind: input, shape index: {}]   ;;  %s1792_s10 = inlined_call_operand.hbm [shape: f32[2,8,32], index: 10, kind: output, shape index: {}]  }
   0x1   :  { %1793 = sst [smem:[#allocation5_spill]] %s1782_s0 }
   0x2   :  { %15 = vsyncpa [#allocation3], 0 }
   0x3   :  { %17 = vsyncpa [#allocation3 + $0x1], 0  ;;  %s1418_s13 = smov 0   ;;  %s1420_s14 = smov 0  }
   0x4   :  { %s1422_s15 = smov 0   ;;  %s1424_s16 = smov 0  }
   0x5 LB: > { %s1439_s17 = sadd.s32 4294967295, %s1360_s16   ;;  %s1141_s18 = sadd.s32 4294967294, %s1360_s16   ;;  %s1360_s16 = sphi %s1424_s16, %s1800_s16   ;;  %s1356_s15 = sphi %s1422_s15, %s1799_s15   ;;  %s1352_s14 = sphi %s1420_s14, %s1798_s14   ;;  %s1348_s13 = sphi %s1418_s13, %s1797_s13  }
   0x6   : > { %s1443_s19 = sadd.s32 1, %s1360_s16   ;;  %s245_s20 = sadd.s32 1, %s1356_s15 }
   0x7   : > { %s242_s21 = ssub.s32 %s1360_s16, %s1443_s19  ;;  %p255_p0 = scmp.ne.s32.totalorder %s1356_s15, %s1352_s14 }
   0x8   : > { %p243_p1 = scmp.eq.s32.totalorder %s242_s21, 0  ;;  %p256_p2 = scmp.eq.s32.totalorder %s1439_s17, 1 }
   0x9   : > { %p261_p3 = scmp.ne.s32.totalorder %s1352_s14, %s1348_s13  ;;  %p262_p4 = scmp.eq.s32.totalorder %s1141_s18, 1 }
   0xa   : > { %s1454_s22 = scalar_select %p243_p1, %s1356_s15, %s245_s20  }
   0xb   : > { %p1456_p5 = por %p256_p2, %p255_p0  ;;  %p1460_p6 = por %p262_p4, %p261_p3 }
   0xc   : > { %p1144_p7 = scmp.ge.s32.totalorder %s1360_s16, 1  ;;  %p314_p8 = scmp.lt.s32.totalorder %s1360_s16, 3 }
   0xe   : > { %p315_p9 = pnand %p1144_p7, %p314_p8 }
   0xf   : > { %p351_p10 = scmp.lt.s32.totalorder (!%p315_p9), %s1439_s17, 1  ;;  %s1796_s0 = sld [smem:[#allocation5_spill]] (!%p315_p9) }
  0x10   : > { %318 = sbr.rel (%p315_p9) target bundleno = 3489 (0xda1), region = 60  ;;  %s1219_s28 = sshll.u32 (!%p315_p9), %s1439_s17, 3 }
  0x11   : > { %s1077_s18 = scalar_lea.hbm (!%p315_p9), %s1792_s10, %s1219_s28 }
  0x15   : > { %s352_s25 = scalar_select %p351_p10, %s1439_s17, 1  ;;  %vm359_vm0 = vcmask 261120   ;;  %v1362_v2 = vmov 32.0   ;;  %v442_v14 = vld [vmem:[%s1787_s5 + $0x10] sm:$0xff]  ;;  %v443_v15 = vld [vmem:[%s1787_s5 + $0x18] sm:$0xff]  ;;  %v440_v17 = vld [vmem:[%s1787_s5] sm:$0xff] }
  0x16   : > { %1272 = vrcp.f32 %v1362_v2  ;;  %v445_v16 = vpack.c.bf16 %v443_v15, %v442_v14  ;;  %v441_v18 = vld [vmem:[%s1787_s5 + $0x8] sm:$0xff]  ;;  %v401_v21 = vld [vmem:[%s1785_s3 + $0x10] sm:$0xff]  ;;  %v402_v22 = vld [vmem:[%s1785_s3 + $0x18] sm:$0xff]  ;;  %vm502_vm5 = vcmask 1043456   ;;  %vm464_vm6 = vcmask 130048  }
  0x17   : > { %s1146_s26 = sshll.u32 %s352_s25, 3  ;;  %v444_v19 = vpack.c.bf16 %v441_v18, %v440_v17  ;;  %v423_v23 = vld [vmem:[%s1786_s4 + $0x10] sm:$0xff]  ;;  %v404_v24 = vpack.c.bf16 %v402_v22, %v401_v21  ;;  %v424_v25 = vld [vmem:[%s1786_s4 + $0x18] sm:$0xff]  ;;  %v399_v30 = vld [vmem:[%s1785_s3] sm:$0xff]  ;;  %vm485_vm7 = vcmask 64512  }
  0x18   : > { %s354_s29 = scalar_lea.vmem %s1796_s0, %s1146_s26  ;;  %455 = vmatpush.bf16.msra.mxu2 %v445_v16  ;;  %v1159_v26 = vld [vmem:[%s1786_s4 + $0x30] sm:$0xff]  ;;  %v1160_v27 = vld [vmem:[%s1786_s4 + $0x38] sm:$0xff]  ;;  %v426_v28 = vpack.c.bf16 %v424_v25, %v423_v23  ;;  %v400_v31 = vld [vmem:[%s1785_s3 + $0x8] sm:$0xff]  ;;  %s348_s26 = sand.u32 1, %s1352_s14  }
  0x19   : > { %v1471_v0 = vld [vmem:[%s354_s29] sm:$0xff]  ;;  %v549_v29 = vpack.c.bf16 %v1160_v27, %v1159_v26  ;;  %414 = vmatpush.bf16.msra.mxu0 %v404_v24  ;;  %v403_v33 = vpack.c.bf16 %v400_v31, %v399_v30  ;;  %v422_v34 = vld [vmem:[%s1786_s4 + $0x8] sm:$0xff]  ;;  %v1154_v40 = vld [vmem:[%s1785_s3 + $0x30] sm:$0xff]  ;;  %s1145_s27 = sshll.u32 %s348_s26, 3  ;;  %s1081_s0 = sshll.u32 %s1077_s18, 4  ;;  %s1082_s0 = int_to_ptr.hbm [resolvable:$true] %s1081_s0 }
  0x1a   : > { %v360_v1 = vsel %vm359_vm0, %v1471_v0, 0.0  ;;  %v1494_v20 = vpack.c.bf16 %v1471_v0, %v1471_v0  ;;  %v421_v32 = vld [vmem:[%s1786_s4] sm:$0xff]  ;;  %v1158_v36 = vld [vmem:[%s1786_s4 + $0x28] sm:$0xff]  ;;  %433 = vmatpush.bf16.msra.mxu1 %v426_v28  ;;  %v1155_v41 = vld [vmem:[%s1785_s3 + $0x38] sm:$0xff]  ;;  %s350_s25 = scalar_lea.vmem [#allocation2], %s1145_s27  ;;  %s1067_s29 = scalar_lea.sflag [#allocation3], %s348_s26 }
  0x1b   : > { %361 = vadd.xlane.f32.xlu0 %v360_v1  ;;  %v1157_v35 = vld [vmem:[%s1786_s4 + $0x20] sm:$0xff]  ;;  %v425_v37 = vpack.c.bf16 %v422_v34, %v421_v32  ;;  %v529_v44 = vpack.c.bf16 %v1155_v41, %v1154_v40  ;;  %v1153_v45 = vld [vmem:[%s1785_s3 + $0x28] sm:$0xff]  ;;  %v1164_v26 = vld [vmem:[%s1787_s5 + $0x30] sm:$0xff]  ;;  %s1079_s17 = sshll.u32 %s350_s25, 4  ;;  %s1312_s30 = sshra.s32 %s1082_s0, 4  ;;  %s1080_s17 = int_to_ptr.vmem [resolvable:$true] %s1079_s17  ;;  %s1313_s30 = int_to_ptr.hbm [resolvable:$true] %s1312_s30 }
  0x1c   : > { %v1273_v3 = vpop.eup %1272  ;;  %456 = vmatpush.bf16.msra.mxu2 %v444_v19  ;;  %v548_v38 = vpack.c.bf16 %v1158_v36, %v1157_v35  ;;  %v1152_v42 = vld [vmem:[%s1785_s3 + $0x20] sm:$0xff]  ;;  %v1165_v27 = vld [vmem:[%s1787_s5 + $0x38] sm:$0xff]  ;;  %v1163_v30 = vld [vmem:[%s1787_s5 + $0x28] sm:$0xff]  ;;  %s1314_s28 = scalar_lea.hbm %s1313_s30, 8  ;;  %s1318_s27 = scalar_lea.hbm %s1792_s10, 16 }
  0x1d   : > { %v364_v4 = vmul.f32 32.0, %v1273_v3  ;;  %vm368_vm1 = vweird.f32 %v1273_v3  ;;  %415 = vmatpush.bf16.msra.mxu0 %v403_v33  ;;  %v528_v47 = vpack.c.bf16 %v1153_v45, %v1152_v42  ;;  %v1262_v54 = vld [vmem:[%s1783_s1] ss:$0 sm:$0xff]  ;;  %p1315_p11 = scmp.ne.s32.totalorder %s1313_s30, %s1314_s28  ;;  %p1319_p0 = scmp.lt.s32.totalorder %s1313_s30, %s1792_s10 }
  0x1e   : > { %434 = vmatpush.bf16.msra.mxu1 %v425_v37  ;;  %v1263_v57 = vld [vmem:[%s1784_s2] ss:$0 sm:$0xff]  ;;  %p1320_p1 = scmp.lt.s32.totalorder %s1318_s27, %s1314_s28 }
  0x1f   : > { %v365_v5 = vsub.f32 1.0, %v364_v4  ;;  %1149 = vmatmul.msk.bf16.vlgmr.msra.gmra.mxu2 %vm359_vm0, %v1494_v20  ;;  %v1162_v28 = vld [vmem:[%s1787_s5 + $0x20] sm:$0xff]  ;;  %p1316_p12 = pnand %p1315_p11, %p1456_p5 }
  0x20   : > { %556 = vmatpush.bf16.msrb.mxu2 %v549_v29  ;;  %v569_v29 = vpack.c.bf16 %v1165_v27, %v1164_v26  ;;  %v568_v31 = vpack.c.bf16 %v1163_v30, %v1162_v28  ;;  %v520_v37 = vld [vmem:[%s1788_s6] sm:$0xff]  ;;  %p1321_p2 = por %p1320_p1, %p1319_p0 }
  0x21   : > { %v366_v6 = vmul.f32 %v1273_v3, %v365_v5  ;;  %p1317_p13 = pneg %p1316_p12 }
  0x22   : > { %536 = vmatpush.bf16.msrb.mxu1 %v529_v44 }
  0x23   : > { %v367_v7 = vadd.f32 %v1273_v3, %v366_v6  ;;  %p1322_p3 = pnand %p1321_p2, %p1317_p13 }
  0x24   : > { %557 = vmatpush.bf16.msrb.mxu2 %v548_v38  ;;  %v521_v38 = vld [vmem:[%s1788_s6 + $0x8] sm:$0xff] }
  0x25   : > { %v1475_v8 = vsel %vm368_vm1, %v1273_v3, %v367_v7 }
  0x26   : > { %537 = vmatpush.bf16.msrb.mxu1 %v528_v47 }
  0x8e   : > { %v362_v9 = vpop.xlane.xlu0 %361 }
  0x8f   : > { %v370_v10 = vmul.f32 %v1475_v8, %v362_v9 }
  0x91   : > { %v371_v11 = vsub.f32 %v1471_v0, %v370_v10 }
  0x93   : > { %v372_v12 = vmul.f32 %v371_v11, %v371_v11 }
  0x95   : > { %v373_v13 = vsel %vm359_vm0, %v372_v12, 0.0 }
  0x96   : > { %374 = vadd.xlane.f32.xlu0 %v373_v13 }
  0xa2   : > { %v458_v61 = vpop.f32.mrf.mxu2 }
  0xa3   : > { %v498_v63 = vpack.c.bf16 %v458_v61, %v458_v61 }
  0xa5   : > { %v504_v1 = vsel %vm502_vm5, %v498_v63, 0 }
  0xa6   : > { %513 = vmatpush.bf16.msrb.mxu0 %v504_v1 }
  0xaa   : > { %v460_v62 = vpop.f32.mrf.mxu2 }
 0x109   : > { %v375_v39 = vpop.xlane.xlu0 %374 }
 0x10a   : > { %v376_v43 = vmul.f32 %v375_v39, %v1475_v8  ;;  %v522_v39 = vpack.c.bf16 %v521_v38, %v520_v37 }
 0x10c   : > { %v377_v46 = vadd.f32 1e-05, %v376_v43 }
 0x10e   : > { %1274 = vrsqrt.f32 %v377_v46  ;;  %vm384_vm3 = vweird.f32 %v377_v46 }
 0x114   : > { %v1275_v48 = vpop.eup %1274 }
 0x115   : > { %v379_v49 = vmul.f32 %v1275_v48, %v377_v46  ;;  %vm385_vm2 = vweird.f32 %v1275_v48 }
 0x116   : > { %vm386_vm4 = vmor %vm384_vm3, %vm385_vm2 }
 0x117   : > { %v380_v50 = vmul.f32 %v1275_v48, %v379_v49 }
 0x119   : > { %v381_v51 = vmul.f32 0.5, %v380_v50 }
 0x11b   : > { %v382_v52 = vsub.f32 1.5, %v381_v51 }
 0x11d   : > { %v383_v53 = vmul.f32 %v1275_v48, %v382_v52 }
 0x11f   : > { %v387_v55 = vsel %vm386_vm4, %v1275_v48, %v383_v53 }
 0x120   : > { %v388_v56 = vmul.f32 %v387_v55, %v371_v11 }
 0x122   : > { %v392_v58 = vmul.f32 %v1262_v54, %v388_v56 }
 0x124   : > { %v396_v59 = vadd.f32 %v1263_v57, %v392_v58  ;;  %v1169_v57 = vld [vmem:[%s1788_s6 + $0x10] sm:$0xff]  ;;  %v1170_v58 = vld [vmem:[%s1788_s6 + $0x18] sm:$0xff] }
 0x126   : > { %v397_v60 = vpack.c.bf16 %v396_v59, %v396_v59  ;;  %v641_v59 = vpack.c.bf16 %v1170_v58, %v1169_v57  ;;  %v1202_v58 = vld [vmem:[%s1786_s4 + $0x78] sm:$0xff] }
 0x128   : > { %1147 = vmatmul.msk.bf16.vlgmr.msra.gmra.mxu0 %vm359_vm0, %v397_v60  ;;  %1148 = vmatmul.msk.bf16.vlgmr.msra.gmra.mxu1 %vm359_vm0, %v397_v60 }
 0x129   : > { %1161 = vmatmul.msk.bf16.vlgmr.msrb.gmra.mxu2 %vm359_vm0, %v397_v60 }
 0x12a   : > { %652 = vmatpush.bf16.msra.mxu2 %v641_v59 }
 0x138   : > { %1156 = vmatmul.msk.bf16.vlgmr.msrb.gmra.mxu1 %vm359_vm0, %v397_v60 }
 0x1a5   : > { %v417_v2 = vpop.f32.mrf.mxu0  ;;  %v436_v3 = vpop.f32.mrf.mxu1 }
 0x1a6   : > { %v463_v4 = vpack.c.bf16 %v436_v3, %v436_v3  ;;  %v462_v11 = vpack.c.bf16 %v417_v2, %v417_v2 }
 0x1a8   : > { %v469_v5 = vsel %vm464_vm6, %v463_v4, 0 }
 0x1a9   : > { %478 = vmatpush.bf16.xpose.msra.mxu3 %v469_v5 }
 0x1ac   : > { %v559_v6 = vpop.f32.mrf.mxu2 }
 0x1ad   : > { %v584_v7 = vpack.c.bf16 %v559_v6, %v559_v6  ;;  %v419_v9 = vpop.f32.mrf.mxu0  ;;  %v438_v10 = vpop.f32.mrf.mxu1  ;;  %v1264_v6 = vld [vmem:[%s1789_s7] ss:$0 sm:$0xff] }
 0x1af   : > { %v589_v12 = vsel %vm464_vm6, %v584_v7, 0 }
 0x1b0   : > { %598 = vmatpush.bf16.xpose.msra.mxu0 %v589_v12  ;;  %1150 = vmatmul.msk.bf16.vlgmr.msra.gmra.mxu3 %vm464_vm6, %v462_v11 }
 0x1b1   : > { %576 = vmatpush.bf16.msrb.mxu3 %v569_v29 }
 0x1b4   : > { %v561_v13 = vpop.f32.mrf.mxu2 }
 0x1b5   : > { %v539_v14 = vpop.f32.mrf.mxu1  ;;  %577 = vmatpush.bf16.msrb.mxu3 %v568_v31 }
 0x1b6   : > { %v583_v36 = vpack.c.bf16 %v539_v14, %v539_v14 }
 0x1b9   : > { %668 = vmatpush.bf16.msra.mxu3 %v522_v39 }
 0x1bd   : > { %v541_v15 = vpop.f32.mrf.mxu1 }
 0x1c0   : > { %1166 = vmatmul.msk.bf16.vlgmr.msrb.gmra.mxu3 %vm359_vm0, %v1494_v20 }
 0x233   : > { %v480_v16 = vpop.f32.mrf.mxu3 }
 0x234   : > { %v484_v17 = vmul.f32 0.25, %v480_v16 }
 0x236   : > { %v486_v18 = vsel %vm485_vm7, %v484_v17, -inf }
 0x237   : > { %487 = vmax.xlane.f32.xlu1 %v486_v18 }
 0x23b   : > { %v482_v19 = vpop.f32.mrf.mxu3 }
 0x23c   : > { %v1185_v19 = vld [vmem:[%s1787_s5 + $0x40] sm:$0xff] }
 0x243   : > { %v579_v20 = vpop.f32.mrf.mxu3 }
 0x244   : > { %v617_v42 = vpack.c.bf16 %v579_v20, %v579_v20  ;;  %v1178_v20 = vld [vmem:[%s1785_s3 + $0x58] sm:$0xff] }
 0x246   : > { %v622_v43 = vsel %vm502_vm5, %v617_v42, 0  ;;  %v1175_v42 = vld [vmem:[%s1785_s3 + $0x40] sm:$0xff] }
 0x247   : > { %631 = vmatpush.bf16.msra.mxu1 %v622_v43  ;;  %v1176_v43 = vld [vmem:[%s1785_s3 + $0x48] sm:$0xff] }
 0x24b   : > { %v581_v45 = vpop.f32.mrf.mxu3 }
 0x2aa   : > { %v488_v21 = vpop.xlane.xlu1 %487 }
 0x2ab   : > { %v489_v22 = vsub.f32 %v484_v17, %v488_v21  ;;  %v1187_v17 = vld [vmem:[%s1787_s5 + $0x50] sm:$0xff]  ;;  %v1186_v21 = vld [vmem:[%s1787_s5 + $0x48] sm:$0xff] }
 0x2ad   : > { %v490_v23 = vmul.f32 1.442695, %v489_v22  ;;  %v796_v22 = vpack.c.bf16 %v1186_v21, %v1185_v19 }
 0x2af   : > { %1276 = vpow2.f32 %v490_v23 }
 0x2b5   : > { %v1277_v24 = vpop.eup %1276 }
 0x2b6   : > { %v492_v25 = vsel %vm485_vm7, %v1277_v24, 0.0 }
 0x2b7   : > { %493 = vadd.xlane.f32.xlu1 %v492_v25 }
 0x32a   : > { %v494_v32 = vpop.xlane.xlu1 %493 }
 0x32b   : > { %1278 = vrcp.f32 %v494_v32  ;;  %v1265_v32 = vld [vmem:[%s1790_s8] ss:$0 sm:$0xff] }
 0x331   : > { %v1279_v33 = vpop.eup %1278 }
 0x332   : > { %v496_v34 = vmul.f32 %v1279_v33, %v1277_v24 }
 0x334   : > { %v497_v35 = vpack.c.bf16 %v496_v34, %v496_v34 }
 0x336   : > { %1151 = vmatmul.msk.bf16.vlgmr.msrb.gmra.mxu0 %vm485_vm7, %v497_v35  ;;  %v1266_v35 = vld [vmem:[%s1791_s9] ss:$0 sm:$0xff] }
 0x346   : > { %1167 = vmatmul.msk.bf16.vlgmr.msra.gmra.mxu0 %vm464_vm6, %v583_v36 }
 0x3b3   : > { %v515_v40 = vpop.f32.mrf.mxu0 }
 0x3b4   : > { %v519_v41 = vpack.c.bf16 %v515_v40, %v515_v40  ;;  %v1177_v40 = vld [vmem:[%s1785_s3 + $0x50] sm:$0xff] }
 0x3b6   : > { %1172 = vmatmul.msk.bf16.vlgmr.msra.gmra.mxu3 %vm464_vm6, %v519_v41  ;;  %v754_v41 = vpack.c.bf16 %v1178_v20, %v1177_v40 }
 0x3b8   : > { %764 = vmatpush.bf16.msrb.mxu0 %v754_v41 }
 0x3bb   : > { %v517_v44 = vpop.f32.mrf.mxu0 }
 0x3bc   : > { %v753_v44 = vpack.c.bf16 %v1176_v43, %v1175_v42 }
 0x3be   : > { %765 = vmatpush.bf16.msrb.mxu0 %v753_v44 }
 0x3c3   : > { %v600_v46 = vpop.f32.mrf.mxu0 }
 0x3c4   : > { %v604_v47 = vmul.f32 0.25, %v600_v46 }
 0x3c6   : > { %v605_v48 = vsel %vm485_vm7, %v604_v47, -inf }
 0x3c7   : > { %606 = vmax.xlane.f32.xlu2 %v605_v48 }
 0x3cb   : > { %v602_v49 = vpop.f32.mrf.mxu0 }
 0x439   : > { %v670_v50 = vpop.f32.mrf.mxu3 }
 0x43a   : > { %v607_v51 = vpop.xlane.xlu2 %606 }
 0x43b   : > { %v608_v52 = vsub.f32 %v604_v47, %v607_v51 }
 0x43d   : > { %v609_v53 = vmul.f32 1.442695, %v608_v52 }
 0x43f   : > { %1280 = vpow2.f32 %v609_v53 }
 0x441   : > { %v672_v54 = vpop.f32.mrf.mxu3 }
 0x442   : > { %v1182_v54 = vld [vmem:[%s1786_s4 + $0x50] sm:$0xff] }
 0x445   : > { %v1281_v55 = vpop.eup %1280 }
 0x446   : > { %v611_v56 = vsel %vm485_vm7, %v1281_v55, 0.0 }
 0x447   : > { %612 = vadd.xlane.f32.xlu2 %v611_v56  ;;  %v1201_v56 = vld [vmem:[%s1786_s4 + $0x70] sm:$0xff] }
 0x448   : > { %v899_v59 = vpack.c.bf16 %v1202_v58, %v1201_v56 }
 0x4ba   : > { %v613_v60 = vpop.xlane.xlu2 %612 }
 0x4bb   : > { %1282 = vrcp.f32 %v613_v60  ;;  %v1180_v60 = vld [vmem:[%s1786_s4 + $0x40] sm:$0xff] }
 0x4c1   : > { %v1283_v61 = vpop.eup %1282 }
 0x4c2   : > { %v615_v62 = vmul.f32 %v1283_v61, %v1281_v55  ;;  %v1183_v55 = vld [vmem:[%s1786_s4 + $0x58] sm:$0xff]  ;;  %v1181_v61 = vld [vmem:[%s1786_s4 + $0x48] sm:$0xff] }
 0x4c3   : > { %v777_v57 = vpack.c.bf16 %v1183_v55, %v1182_v54 }
 0x4c4   : > { %v616_v63 = vpack.c.bf16 %v615_v62, %v615_v62  ;;  %v1199_v62 = vld [vmem:[%s1786_s4 + $0x60] sm:$0xff] }
 0x4c5   : > { %784 = vmatpush.bf16.msrb.mxu1 %v777_v57 }
 0x4c6   : > { %1168 = vmatmul.msk.bf16.vlgmr.msra.gmra.mxu1 %vm485_vm7, %v616_v63  ;;  %v776_v63 = vpack.c.bf16 %v1181_v61, %v1180_v60 }
 0x4c9   : > { %785 = vmatpush.bf16.msrb.mxu1 %v776_v63  ;;  %v1192_v63 = vld [vmem:[%s1788_s6 + $0x20] sm:$0xff] }
 0x543   : > { %v633_v1 = vpop.f32.mrf.mxu1 }
 0x544   : > { %v637_v2 = vpack.c.bf16 %v633_v1, %v633_v1  ;;  %v1200_v1 = vld [vmem:[%s1786_s4 + $0x68] sm:$0xff] }
 0x546   : > { %1171 = vmatmul.msk.bf16.vlgmr.msra.gmra.mxu2 %vm464_vm6, %v637_v2  ;;  %v898_v2 = vpack.c.bf16 %v1200_v1, %v1199_v62  ;;  %v1193_v1 = vld [vmem:[%s1788_s6 + $0x28] sm:$0xff] }
 0x54b   : > { %v635_v3 = vpop.f32.mrf.mxu1 }
 0x5c9   : > { %v654_v4 = vpop.f32.mrf.mxu2 }
 0x5ca   : > { %v671_v5 = vadd.f32 %v670_v50, %v654_v4  ;;  %v1196_v4 = vld [vmem:[%s1785_s3 + $0x70] sm:$0xff] }
 0x5cc   : > { %v674_v7 = vadd.f32 %v671_v5, %v1471_v0  ;;  %v1188_v0 = vld [vmem:[%s1787_s5 + $0x58] sm:$0xff] }
 0x5cd   : > { %v797_v18 = vpack.c.bf16 %v1188_v0, %v1187_v17  ;;  %v1197_v5 = vld [vmem:[%s1785_s3 + $0x78] sm:$0xff] }
 0x5ce   : > { %v679_v9 = vadd.f32 %v1264_v6, %v674_v7  ;;  %v1194_v6 = vld [vmem:[%s1785_s3 + $0x60] sm:$0xff] }
 0x5cf   : > { %807 = vmatpush.bf16.msrb.mxu2 %v797_v18  ;;  %v1267_v18 = vld [vmem:[%s1783_s1 + $0x1] ss:$0 sm:$0xff] }
 0x5d0   : > { %v682_v10 = vsel %vm359_vm0, %v679_v9, 0.0 }
 0x5d1   : > { %683 = vadd.xlane.f32.xlu0 %v682_v10  ;;  %v656_v11 = vpop.f32.mrf.mxu2  ;;  %v1195_v10 = vld [vmem:[%s1785_s3 + $0x68] sm:$0xff] }
 0x5d3   : > { %808 = vmatpush.bf16.msrb.mxu2 %v796_v22  ;;  %v1268_v22 = vld [vmem:[%s1784_s2 + $0x1] ss:$0 sm:$0xff] }
 0x5d7   : > { %906 = vmatpush.bf16.msra.mxu2 %v899_v59 }
 0x5db   : > { %907 = vmatpush.bf16.msra.mxu2 %v898_v2  ;;  %v872_v2 = vpack.c.bf16 %v1193_v1, %v1192_v63 }
 0x644   : > { %v684_v12 = vpop.xlane.xlu0 %683 }
 0x645   : > { %v685_v13 = vmul.f32 %v684_v12, %v1475_v8  ;;  %v878_v12 = vpack.c.bf16 %v1195_v10, %v1194_v6 }
 0x647   : > { %v686_v14 = vsub.f32 %v679_v9, %v685_v13  ;;  %v879_v9 = vpack.c.bf16 %v1197_v5, %v1196_v4 }
 0x649   : > { %v687_v15 = vmul.f32 %v686_v14, %v686_v14  ;;  %886 = vmatpush.bf16.msra.mxu1 %v879_v9 }
 0x64b   : > { %v688_v16 = vsel %vm359_vm0, %v687_v15, 0.0 }
 0x64c   : > { %689 = vadd.xlane.f32.xlu1 %v688_v16 }
 0x64d   : > { %887 = vmatpush.bf16.msra.mxu1 %v878_v12 }
 0x6bf   : > { %v690_v23 = vpop.xlane.xlu1 %689 }
 0x6c0   : > { %v691_v24 = vmul.f32 %v690_v23, %v1475_v8 }
 0x6c2   : > { %v692_v25 = vadd.f32 1e-05, %v691_v24 }
 0x6c4   : > { %1284 = vrsqrt.f32 %v692_v25  ;;  %vm699_vm9 = vweird.f32 %v692_v25 }
 0x6ca   : > { %v1285_v26 = vpop.eup %1284 }
 0x6cb   : > { %v694_v27 = vmul.f32 %v1285_v26, %v692_v25  ;;  %vm700_vm8 = vweird.f32 %v1285_v26 }
 0x6cc   : > { %vm701_vm10 = vmor %vm699_vm9, %vm700_vm8 }
 0x6cd   : > { %v695_v28 = vmul.f32 %v1285_v26, %v694_v27  ;;  %v1207_v27 = vld [vmem:[%s1787_s5 + $0x78] sm:$0xff] }
 0x6cf   : > { %v696_v29 = vmul.f32 0.5, %v695_v28 }
 0x6d1   : > { %v697_v30 = vsub.f32 1.5, %v696_v29 }
 0x6d3   : > { %v698_v31 = vmul.f32 %v1285_v26, %v697_v30 }
 0x6d5   : > { %v702_v33 = vsel %vm701_vm10, %v1285_v26, %v698_v31  ;;  %v1206_v26 = vld [vmem:[%s1787_s5 + $0x70] sm:$0xff] }
 0x6d6   : > { %v703_v34 = vmul.f32 %v702_v33, %v686_v14  ;;  %v919_v31 = vpack.c.bf16 %v1207_v27, %v1206_v26  ;;  %v1205_v33 = vld [vmem:[%s1787_s5 + $0x68] sm:$0xff] }
 0x6d8   : > { %v707_v36 = vmul.f32 %v1265_v32, %v703_v34  ;;  %v1204_v32 = vld [vmem:[%s1787_s5 + $0x60] sm:$0xff] }
 0x6da   : > { %v1623_v37 = vadd.f32 %v1266_v35, %v707_v36  ;;  %v918_v35 = vpack.c.bf16 %v1205_v33, %v1204_v32 }
 0x6dc   : > { %v716_v38 = vsel %vm359_vm0, %v1623_v37, 0.0  ;;  %v1629_v39 = vpack.c.bf16 %v1623_v37, %v1623_v37 }
 0x6dd   : > { %717 = vadd.xlane.f32.xlu2 %v716_v38 }
 0x6de   : > { %1189 = vmatmul.msk.bf16.vlgmr.msrb.gmra.mxu2 %vm359_vm0, %v1629_v39 }
 0x750   : > { %v718_v45 = vpop.xlane.xlu2 %717 }
 0x751   : > { %v719_v46 = vmul.f32 %v718_v45, %v1475_v8 }
 0x753   : > { %v720_v47 = vsub.f32 %v1623_v37, %v719_v46 }
 0x755   : > { %v721_v48 = vmul.f32 %v720_v47, %v720_v47 }
 0x757   : > { %v722_v49 = vsel %vm359_vm0, %v721_v48, 0.0 }
 0x758   : > { %723 = vadd.xlane.f32.xlu0 %v722_v49 }
 0x761   : > { %v810_v50 = vpop.f32.mrf.mxu2 }
 0x762   : > { %v848_v51 = vpack.c.bf16 %v810_v50, %v810_v50 }
 0x764   : > { %v853_v52 = vsel %vm502_vm5, %v848_v51, 0 }
 0x765   : > { %862 = vmatpush.bf16.msra.mxu0 %v853_v52 }
 0x769   : > { %v812_v53 = vpop.f32.mrf.mxu2 }
 0x7cb   : > { %v724_v3 = vpop.xlane.xlu0 %723 }
 0x7cc   : > { %v725_v7 = vmul.f32 %v724_v3, %v1475_v8 }
 0x7ce   : > { %v726_v11 = vadd.f32 1e-05, %v725_v7 }
 0x7d0   : > { %1286 = vrsqrt.f32 %v726_v11  ;;  %vm733_vm12 = vweird.f32 %v726_v11 }
 0x7d6   : > { %v1287_v13 = vpop.eup %1286 }
 0x7d7   : > { %v728_v14 = vmul.f32 %v1287_v13, %v726_v11  ;;  %vm734_vm11 = vweird.f32 %v1287_v13 }
 0x7d8   : > { %vm735_vm13 = vmor %vm733_vm12, %vm734_vm11 }
 0x7d9   : > { %v729_v15 = vmul.f32 %v1287_v13, %v728_v14 }
 0x7db   : > { %v730_v16 = vmul.f32 0.5, %v729_v15 }
 0x7dd   : > { %v731_v17 = vsub.f32 1.5, %v730_v16 }
 0x7df   : > { %v732_v0 = vmul.f32 %v1287_v13, %v731_v17 }
 0x7e1   : > { %v736_v19 = vsel %vm735_vm13, %v1287_v13, %v732_v0  ;;  %v1211_v0 = vld [vmem:[%s1788_s6 + $0x30] sm:$0xff] }
 0x7e2   : > { %v737_v21 = vmul.f32 %v736_v19, %v720_v47 }
 0x7e4   : > { %v741_v23 = vmul.f32 %v1267_v18, %v737_v21  ;;  %v1212_v18 = vld [vmem:[%s1788_s6 + $0x38] sm:$0xff] }
 0x7e5   : > { %v991_v19 = vpack.c.bf16 %v1212_v18, %v1211_v0 }
 0x7e6   : > { %v745_v24 = vadd.f32 %v1268_v22, %v741_v23 }
 0x7e7   : > { %1002 = vmatpush.bf16.msrb.mxu2 %v991_v19 }
 0x7e8   : > { %v746_v25 = vpack.c.bf16 %v745_v24, %v745_v24 }
 0x7ea   : > { %1179 = vmatmul.msk.bf16.vlgmr.msrb.gmra.mxu0 %vm359_vm0, %v746_v25  ;;  %1184 = vmatmul.msk.bf16.vlgmr.msrb.gmra.mxu1 %vm359_vm0, %v746_v25 }
 0x7eb   : > { %1203 = vmatmul.msk.bf16.vlgmr.msra.gmra.mxu2 %vm359_vm0, %v746_v25 }
 0x7fa   : > { %1198 = vmatmul.msk.bf16.vlgmr.msra.gmra.mxu1 %vm359_vm0, %v746_v25 }
 0x867   : > { %v767_v28 = vpop.f32.mrf.mxu0  ;;  %v787_v29 = vpop.f32.mrf.mxu1 }
 0x868   : > { %v815_v30 = vpack.c.bf16 %v787_v29, %v787_v29  ;;  %v814_v41 = vpack.c.bf16 %v767_v28, %v767_v28 }
 0x86a   : > { %v820_v34 = vsel %vm464_vm6, %v815_v30, 0  ;;  %v1269_v30 = vld [vmem:[%s1789_s7 + $0x1] ss:$0 sm:$0xff] }
 0x86b   : > { %829 = vmatpush.bf16.xpose.msrb.mxu3 %v820_v34 }
 0x86e   : > { %v909_v36 = vpop.f32.mrf.mxu2 }
 0x86f   : > { %v934_v38 = vpack.c.bf16 %v909_v36, %v909_v36  ;;  %v769_v40 = vpop.f32.mrf.mxu0  ;;  %v789_v20 = vpop.f32.mrf.mxu1 }
 0x871   : > { %v939_v42 = vsel %vm464_vm6, %v934_v38, 0 }
 0x872   : > { %948 = vmatpush.bf16.xpose.msrb.mxu0 %v939_v42  ;;  %1190 = vmatmul.msk.bf16.vlgmr.msrb.gmra.mxu3 %vm464_vm6, %v814_v41 }
 0x873   : > { %926 = vmatpush.bf16.msra.mxu3 %v919_v31 }
 0x876   : > { %v911_v43 = vpop.f32.mrf.mxu2 }
 0x877   : > { %927 = vmatpush.bf16.msra.mxu3 %v918_v35  ;;  %v889_v44 = vpop.f32.mrf.mxu1 }
 0x878   : > { %v933_v62 = vpack.c.bf16 %v889_v44, %v889_v44 }
 0x87b   : > { %1018 = vmatpush.bf16.msrb.mxu3 %v872_v2 }
 0x87f   : > { %v891_v45 = vpop.f32.mrf.mxu1 }
 0x882   : > { %1208 = vmatmul.msk.bf16.vlgmr.msra.gmra.mxu3 %vm359_vm0, %v1629_v39 }
 0x8f5   : > { %v831_v46 = vpop.f32.mrf.mxu3 }
 0x8f6   : > { %v835_v47 = vmul.f32 0.25, %v831_v46 }
 0x8f8   : > { %v836_v48 = vsel %vm485_vm7, %v835_v47, -inf }
 0x8f9   : > { %837 = vmax.xlane.f32.xlu1 %v836_v48 }
 0x8fd   : > { %v833_v49 = vpop.f32.mrf.mxu3 }
 0x8fe   : > { %v1270_v49 = vld [vmem:[%s1790_s8 + $0x1] ss:$0 sm:$0xff] }
 0x905   : > { %v929_v50 = vpop.f32.mrf.mxu3 }
 0x906   : > { %v967_v51 = vpack.c.bf16 %v929_v50, %v929_v50 }
 0x908   : > { %v972_v52 = vsel %vm502_vm5, %v967_v51, 0  ;;  %v1271_v51 = vld [vmem:[%s1791_s9 + $0x1] ss:$0 sm:$0xff] }
 0x909   : > { %981 = vmatpush.bf16.msrb.mxu1 %v972_v52 }
 0x90d   : > { %v931_v53 = vpop.f32.mrf.mxu3 }
 0x96c   : > { %v838_v54 = vpop.xlane.xlu1 %837 }
 0x96d   : > { %v839_v55 = vsub.f32 %v835_v47, %v838_v54 }
 0x96f   : > { %v840_v56 = vmul.f32 1.442695, %v839_v55 }
 0x971   : > { %1288 = vpow2.f32 %v840_v56 }
 0x977   : > { %v1289_v57 = vpop.eup %1288 }
 0x978   : > { %v842_v58 = vsel %vm485_vm7, %v1289_v57, 0.0 }
 0x979   : > { %843 = vadd.xlane.f32.xlu2 %v842_v58 }
 0x9ec   : > { %v844_v39 = vpop.xlane.xlu2 %843 }
 0x9ed   : > { %1290 = vrcp.f32 %v844_v39 }
 0x9f3   : > { %v1291_v59 = vpop.eup %1290 }
 0x9f4   : > { %v846_v60 = vmul.f32 %v1291_v59, %v1289_v57 }
 0x9f6   : > { %v847_v61 = vpack.c.bf16 %v846_v60, %v846_v60 }
 0x9f8   : > { %1191 = vmatmul.msk.bf16.vlgmr.msra.gmra.mxu0 %vm485_vm7, %v847_v61 }
 0xa08   : > { %1209 = vmatmul.msk.bf16.vlgmr.msrb.gmra.mxu0 %vm464_vm6, %v933_v62 }
 0xa75   : > { %v864_v3 = vpop.f32.mrf.mxu0 }
 0xa76   : > { %v868_v4 = vpack.c.bf16 %v864_v3, %v864_v3 }
 0xa78   : > { %1214 = vmatmul.msk.bf16.vlgmr.msrb.gmra.mxu3 %vm464_vm6, %v868_v4 }
 0xa7d   : > { %v866_v5 = vpop.f32.mrf.mxu0 }
 0xa85   : > { %v950_v6 = vpop.f32.mrf.mxu0 }
 0xa86   : > { %v954_v7 = vmul.f32 0.25, %v950_v6 }
 0xa88   : > { %v955_v9 = vsel %vm485_vm7, %v954_v7, -inf }
 0xa89   : > { %956 = vmax.xlane.f32.xlu0 %v955_v9 }
 0xa8d   : > { %v952_v10 = vpop.f32.mrf.mxu0 }
 0xafb   : > { %v1020_v11 = vpop.f32.mrf.mxu3 }
 0xafc   : > { %v957_v12 = vpop.xlane.xlu0 %956 }
 0xafd   : > { %v958_v13 = vsub.f32 %v954_v7, %v957_v12 }
 0xaff   : > { %v959_v14 = vmul.f32 1.442695, %v958_v13 }
 0xb01   : > { %1292 = vpow2.f32 %v959_v14 }
 0xb03   : > { %v1022_v15 = vpop.f32.mrf.mxu3 }
 0xb07   : > { %v1293_v16 = vpop.eup %1292 }
 0xb08   : > { %v961_v17 = vsel %vm485_vm7, %v1293_v16, 0.0 }
 0xb09   : > { %962 = vadd.xlane.f32.xlu1 %v961_v17 }
 0xb7c   : > { %v963_v21 = vpop.xlane.xlu1 %962 }
 0xb7d   : > { %1294 = vrcp.f32 %v963_v21 }
 0xb83   : > { %v1295_v22 = vpop.eup %1294 }
 0xb84   : > { %v965_v23 = vmul.f32 %v1295_v22, %v1293_v16 }
 0xb86   : > { %v966_v24 = vpack.c.bf16 %v965_v23, %v965_v23 }
 0xb88   : > { %1210 = vmatmul.msk.bf16.vlgmr.msrb.gmra.mxu1 %vm485_vm7, %v966_v24 }
 0xc05   : > { %v983_v25 = vpop.f32.mrf.mxu1 }
 0xc06   : > { %v987_v26 = vpack.c.bf16 %v983_v25, %v983_v25 }
 0xc08   : > { %1213 = vmatmul.msk.bf16.vlgmr.msrb.gmra.mxu2 %vm464_vm6, %v987_v26 }
 0xc0d   : > { %v985_v27 = vpop.f32.mrf.mxu1 }
 0xc8b   : > { %v1004_v28 = vpop.f32.mrf.mxu2 }
 0xc8c   : > { %v1021_v29 = vadd.f32 %v1020_v11, %v1004_v28 }
 0xc8e   : > { %v1024_v31 = vadd.f32 %v1021_v29, %v1623_v37 }
 0xc90   : > { %v1030_v32 = vadd.f32 %v1269_v30, %v1024_v31 }
 0xc92   : > { %v1035_v33 = vsel %vm359_vm0, %v1030_v32, 0.0 }
 0xc93   : > { %1036 = vadd.xlane.f32.xlu2 %v1035_v33  ;;  %v1006_v34 = vpop.f32.mrf.mxu2 }
 0xd06   : > { %v1037_v35 = vpop.xlane.xlu2 %1036 }
 0xd07   : > { %v1038_v36 = vmul.f32 %v1037_v35, %v1475_v8 }
 0xd09   : > { %v1039_v38 = vsub.f32 %v1030_v32, %v1038_v36 }
 0xd0b   : > { %v1040_v40 = vmul.f32 %v1039_v38, %v1039_v38 }
 0xd0d   : > { %v1041_v20 = vsel %vm359_vm0, %v1040_v40, 0.0 }
 0xd0e   : > { %1042 = vadd.xlane.f32.xlu0 %v1041_v20 }
 0xd81   : > { %v1043_v41 = vpop.xlane.xlu0 %1042 }
 0xd82   : > { %v1044_v42 = vmul.f32 %v1043_v41, %v1475_v8 }
 0xd84   : > { %v1045_v43 = vadd.f32 1e-05, %v1044_v42 }
 0xd86   : > { %1296 = vrsqrt.f32 %v1045_v43  ;;  %vm1052_vm15 = vweird.f32 %v1045_v43 }
 0xd8c   : > { %v1297_v37 = vpop.eup %1296 }
 0xd8d   : > { %v1047_v44 = vmul.f32 %v1297_v37, %v1045_v43  ;;  %vm1053_vm14 = vweird.f32 %v1297_v37 }
 0xd8e   : > { %vm1054_vm1 = vmor %vm1052_vm15, %vm1053_vm14 }
 0xd8f   : > { %v1048_v45 = vmul.f32 %v1297_v37, %v1047_v44 }
 0xd91   : > { %v1049_v46 = vmul.f32 0.5, %v1048_v45 }
 0xd93   : > { %v1050_v47 = vsub.f32 1.5, %v1049_v46 }
 0xd95   : > { %v1051_v48 = vmul.f32 %v1297_v37, %v1050_v47 }
 0xd97   : > { %v1055_v8 = vsel %vm1054_vm1, %v1297_v37, %v1051_v48 }
 0xd98   : > { %v1056_v50 = vmul.f32 %v1055_v8, %v1039_v38 }
 0xd9a   : > { %v1060_v52 = vmul.f32 %v1270_v49, %v1056_v50 }
 0xd9c   : > { %v1064_v53 = vadd.f32 %v1271_v51, %v1060_v52 }
 0xd9e   : > { %1065 = vst.msk [vmem:[%s350_s25] sm:$0xff] %vm359_vm0, %v1064_v53 }
 0xd9f   : > { %1325 = shalt.err (!%p1322_p3)
}
 0xda0   : > { %1222 = dma.vmem_to_hbm [thread:$0]  (%p1456_p5), %s1080_s17, 128, %s1082_s0, %s1067_s29  }
 0xda1 PF: > { %p1228_p4 = scmp.ge.s32.totalorder %s1360_s16, 2  ;;  %s1093_s26 = sand.u32 1, %s1348_s13  }
 0xda2   : > { %s1094_s21 = scalar_lea.sflag [#allocation3], %s1093_s26 }
 0xda3   : > { %p1225_p7 = pnand %p1228_p4, %p1460_p6 }
 0xda5   : > { %p1226_p8 = pneg %p1225_p7 }
 0xda7   : > { %1343 = dma.done.wait (%p1226_p8), %s1094_s21, 128  }
 0xda8   : > { %1345 = vsyncadd (%p1226_p8), %s1094_s21, 4294967168  ;;  %p20_p9 = scmp.ge.s32.totalorder %s1443_s19, 4   ;;  %s1797_s13 = smov %s1352_s14 }
 0xda9   : > { %s1798_s14 = smov %s1356_s15  ;;  %s1799_s15 = smov %s1454_s22 }
 0xdaa   : > { %s1800_s16 = smov %s1443_s19  ;;  %22 = sbr.rel (!%p20_p9) target bundleno = 5 (0x5), region = 112 }
 0xdaf   :  { %1100 = vsyncpa [#allocation3], 1 }
 0xdb0   :  { %1102 = vsyncpa [#allocation3 + $0x1], 1 }

</bundles_post_ra>
